<compile_context>
chip_gen: v5e
topology: v5e:2x2
jax: 0.10.0
libtpu: 0.0.40
codegen_flags: <defaults>
</compile_context>

<pallas_src>
import functools

import numpy as np

import jax
import jax.numpy as jnp
from jax.experimental import pallas as pl
from jax.experimental.pallas import tpu as pltpu


# ---------------------------------------------------------------------------
# Kernel: log-eigenvalue reconstruction restricted to the upper triangle
# ---------------------------------------------------------------------------
def _logm_triu_kernel(w_ref, qt_ref, r_ref, c_ref, o_ref, *, eps):
    # w_ref : (TB, N, 1)   eigenvalues (N on the sublane axis)
    # qt_ref: (TB, N, N)   Qt[b, k, i] = Q[b, i, k]   (eigenvector matrix, transposed)
    # r_ref : (N, Vp)      one-hot selector: R[i, v] = 1 iff i == row(v)   (resident)
    # c_ref : (N, Vp)      one-hot selector: C[i, v] = 1 iff i == col(v)   (resident)
    # o_ref : (TB, Vp)     lane-dense output (Vp multiple of 128)
    tb, n, _ = qt_ref.shape
    vp = r_ref.shape[1]

    w = w_ref[...]
    if eps is not None:
        w = jnp.maximum(w, jnp.asarray(eps, w.dtype))
    logw = jnp.log(w)                                  # (TB, N, 1), EUP

    qt = qt_ref[...]                                   # (TB, N, N)
    qs = qt * logw                                     # scale row k by log(w_k), VPU

    # Triangle selection as matmuls against the VMEM-resident one-hot matrices.
    # Flatten batch into M so the MXU sees one (TB*N, N) x (N, Vp) matmul per
    # selector (no tiny batched matmuls).  HIGHEST precision keeps the f32
    # selection exact (one-hot weights).
    qsr = jnp.dot(qs.reshape(tb * n, n), r_ref[...],
                  precision=jax.lax.Precision.HIGHEST,
                  preferred_element_type=jnp.float32).reshape(tb, n, vp)
    qc = jnp.dot(qt.reshape(tb * n, n), c_ref[...],
                 precision=jax.lax.Precision.HIGHEST,
                 preferred_element_type=jnp.float32).reshape(tb, n, vp)

    # out[b, v] = sum_k log(w[b,k]) * Q[b, row(v), k] * Q[b, col(v), k]
    o_ref[...] = jnp.sum(qsr * qc, axis=1).astype(o_ref.dtype)   # sublane reduce


# ---------------------------------------------------------------------------
# Helpers
# ---------------------------------------------------------------------------
@functools.lru_cache(maxsize=None)
def _selector_matrices(n, v_pad):
    """One-hot (N, Vp) selectors for the row-major upper triangle (pad cols = 0)."""
    rows, cols = np.triu_indices(n)
    v = rows.shape[0]
    r = np.zeros((n, v_pad), np.float32)
    c = np.zeros((n, v_pad), np.float32)
    r[rows, np.arange(v)] = 1.0
    c[cols, np.arange(v)] = 1.0
    return r, c


def _plan_tiles(batch, n, v_pad):
    """Pick (TB, B_pad, vmem_limit_bytes) from an explicit, generation-aware
    VMEM budget.  Counts double-buffered input/output blocks, the resident
    selector matrices and the in-kernel (TB, N, Vp) temporaries."""
    itm = 4
    per_row = (2 * n * n * itm        # Qt block, double-buffered
               + 2 * n * itm          # eigenvalue block, double-buffered
               + 2 * v_pad * itm      # output block, double-buffered
               + 3 * n * v_pad * itm)  # kernel temporaries (qsr, qc, product)
    resident = 2 * 2 * n * v_pad * itm  # R & C selector blocks (conservative)

    try:
        phys = int(pltpu.get_tpu_info().vmem_capacity_bytes)
    except Exception:                  # e.g. no device info at trace time
        phys = 64 * 1024 * 1024        # conservative (v7x) fallback
    budget = min(phys // 3, 40 * 1024 * 1024)   # ~21 MiB on v7x, 40 MiB on v5e/v6e

    tb_fit = max(8, ((budget - resident) // per_row) // 8 * 8)
    # Guarantee >= 2 grid steps so the "parallel" axis can split across the two
    # TensorCores on v7x (and amortize nothing is lost on single-TC parts).
    tb_half = max(8, pl.cdiv(batch, 16) * 8)
    tb = int(max(8, min(512, tb_fit, tb_half)))

    b_pad = int(max(pl.cdiv(batch, tb) * tb, 2 * tb))
    est = resident + tb * per_row + (4 * 1024 * 1024)
    vmem_limit = int(min(phys, max(est, 32 * 1024 * 1024)))
    return tb, b_pad, vmem_limit


# ---------------------------------------------------------------------------
# Wrapper (reshape, regularization, eigh, pallas_call)
# ---------------------------------------------------------------------------
def matrix_vectorization_layer(spd, *, matrix_size, epsilon=None,
                               regularization_term_added_to_diagonal=0.0):
    N = int(matrix_size)
    V = N * (N + 1) // 2
    Vp = pl.cdiv(V, 128) * 128                       # lane-dense padded width

    lead = spd.shape[:-2]
    assert spd.shape[-2] == spd.shape[-1] == N
    B = 1
    for d in lead:
        B *= int(d)
    x = spd.reshape(B, N, N).astype(jnp.float32)

    # Diagonal regularization fused into XLA (no dedicated kernel).
    reg = regularization_term_added_to_diagonal
    if reg is not None and reg != 0.0:
        x = x + jnp.asarray(reg, x.dtype) * jnp.eye(N, dtype=x.dtype)

    # Eigendecomposition in XLA (see TODO at top of file).
    w, Q = jnp.linalg.eigh(x)                        # x = Q @ diag(w) @ Q^T

    TB, B_pad, vmem_limit = _plan_tiles(B, N, Vp)
    if B_pad != B:
        pad = B_pad - B
        Q = jnp.concatenate([Q, jnp.zeros((pad, N, N), Q.dtype)], axis=0)
        w = jnp.concatenate([w, jnp.ones((pad, N), w.dtype)], axis=0)

    Qt = jnp.swapaxes(Q, -1, -2)                     # Qt[b, k, i] = Q[b, i, k]
    w3 = w[:, :, None]                               # (B_pad, N, 1)

    r_np, c_np = _selector_matrices(N, Vp)
    R = jnp.asarray(r_np)
    C = jnp.asarray(c_np)

    out = pl.pallas_call(
        functools.partial(
            _logm_triu_kernel,
            eps=None if epsilon is None else float(epsilon)),
        out_shape=jax.ShapeDtypeStruct((B_pad, Vp), jnp.float32),
        grid=(B_pad // TB,),
        in_specs=[
            pl.BlockSpec((TB, N, 1), lambda b: (b, 0, 0)),   # eigenvalues
            pl.BlockSpec((TB, N, N), lambda b: (b, 0, 0)),   # Q^T stream
            pl.BlockSpec((N, Vp), lambda b: (0, 0)),         # row selector (resident)
            pl.BlockSpec((N, Vp), lambda b: (0, 0)),         # col selector (resident)
        ],
        out_specs=pl.BlockSpec((TB, Vp), lambda b: (b, 0)),
        compiler_params=pltpu.CompilerParams(
            dimension_semantics=("parallel",),
            vmem_limit_bytes=vmem_limit),
    )(w3, Qt, R, C)

    return out[:B, :V].reshape(*lead, V)


# ---------------------------------------------------------------------------
# Pure-JAX reference (same math, no Pallas) for a sanity check
# ---------------------------------------------------------------------------
def _reference(spd, N, eps, reg):
    A = spd.astype(jnp.float32)
    if reg is not None and reg != 0.0:
        A = A + reg * jnp.eye(N, dtype=A.dtype)
    w, Q = jnp.linalg.eigh(A)
    if eps is not None:
        w = jnp.maximum(w, eps)
    L = jnp.einsum("...ik,...k,...jk->...ij", Q, jnp.log(w), Q)
    r, c = jnp.triu_indices(N)
    return L[..., r, c]


if __name__ == "__main__":
    key = jax.random.PRNGKey(0)
    N = 16                      # matrix_size
    lead = (2, 2)               # leading (batch-like) dims
    eps = 1e-6
    reg = 1e-3

    X = jax.random.normal(key, (*lead, N, N), jnp.float32)
    # build SPD matrices: X X^T / N + I
    spd = jnp.einsum("...ij,...kj->...ik", X, X) / N + jnp.eye(N, dtype=jnp.float32)

    out = matrix_vectorization_layer(
        spd, matrix_size=N, epsilon=eps,
        regularization_term_added_to_diagonal=reg)
    out = jax.block_until_ready(out)

    assert out.shape == (*lead, N * (N + 1) // 2), out.shape

    ref = jax.block_until_ready(_reference(spd, N, eps, reg))
    # HIGHEST-precision selection matmul keeps the kernel ~1e-6 from the f32
    # reference; 1e-3 tolerance leaves slack for MXU f32-emulation differences.
    assert jnp.allclose(out, ref, atol=1e-3, rtol=1e-3), float(
        jnp.max(jnp.abs(out - ref)))

    print("KERNEL_OK")
</pallas_src>

<mosaic_0001>
module attributes {stable_mosaic.version = 11 : i64} {
  func.func @_logm_triu_kernel(%arg0: i32, %arg1: memref<8x16x1xf32, #tpu.memory_space<vmem>>, %arg2: memref<8x16x16xf32, #tpu.memory_space<vmem>>, %arg3: memref<16x256xf32, #tpu.memory_space<vmem>>, %arg4: memref<16x256xf32, #tpu.memory_space<vmem>>, %arg5: memref<8x256xf32, #tpu.memory_space<vmem>>) attributes {dimension_semantics = [#tpu.dimension_semantics<parallel>], iteration_bounds = array<i64: 2>, scalar_prefetch = 0 : i64, scratch_operands = 0 : i64, tpu.core_type = #tpu.core_type<tc>, window_params = [{transform_indices = @transform_0, window_bounds = array<i64: 8, 16, 1>}, {transform_indices = @transform_1, window_bounds = array<i64: 8, 16, 16>}, {pipeline_mode = #tpu.pipeline_mode<synchronous>, transform_indices = @transform_2, window_bounds = array<i64: 16, 256>}, {pipeline_mode = #tpu.pipeline_mode<synchronous>, transform_indices = @transform_3, window_bounds = array<i64: 16, 256>}, {transform_indices = @transform_4, window_bounds = array<i64: 8, 256>}]} {
    %c0 = arith.constant 0 : index
    %c0_0 = arith.constant 0 : index
    %c0_1 = arith.constant 0 : index
    %0 = vector.load %arg1[%c0, %c0_0, %c0_1] : memref<8x16x1xf32, #tpu.memory_space<vmem>>, vector<8x16x1xf32>
    %cst = arith.constant 9.99999997E-7 : f32
    %1 = vector.broadcast %cst : f32 to vector<8x16x1xf32>
    %2 = arith.maximumf %0, %1 : vector<8x16x1xf32>
    %3 = math.log %2 : vector<8x16x1xf32>
    %c0_2 = arith.constant 0 : index
    %c0_3 = arith.constant 0 : index
    %c0_4 = arith.constant 0 : index
    %4 = vector.load %arg2[%c0_2, %c0_3, %c0_4] : memref<8x16x16xf32, #tpu.memory_space<vmem>>, vector<8x16x16xf32>
    %5 = vector.broadcast %3 : vector<8x16x1xf32> to vector<8x16x16xf32>
    %6 = arith.mulf %4, %5 : vector<8x16x16xf32>
    %7 = vector.shape_cast %6 : vector<8x16x16xf32> to vector<128x16xf32>
    %c0_5 = arith.constant 0 : index
    %c0_6 = arith.constant 0 : index
    %8 = vector.load %arg3[%c0_5, %c0_6] : memref<16x256xf32, #tpu.memory_space<vmem>>, vector<16x256xf32>
    %cst_7 = arith.constant dense<0.000000e+00> : vector<128x256xf32>
    %9 = tpu.matmul %7, %8, %cst_7 {dimension_numbers = #tpu.dot_dimension_numbers<[1], [0], [0], [1], [0, 0, 1, 1], [], []>, precision = #tpu.contract_precision<fp32>} : vector<128x16xf32>, vector<16x256xf32>, vector<128x256xf32> -> vector<128x256xf32>
    %10 = vector.shape_cast %9 : vector<128x256xf32> to vector<8x16x256xf32>
    %11 = vector.shape_cast %4 : vector<8x16x16xf32> to vector<128x16xf32>
    %c0_8 = arith.constant 0 : index
    %c0_9 = arith.constant 0 : index
    %12 = vector.load %arg4[%c0_8, %c0_9] : memref<16x256xf32, #tpu.memory_space<vmem>>, vector<16x256xf32>
    %cst_10 = arith.constant dense<0.000000e+00> : vector<128x256xf32>
    %13 = tpu.matmul %11, %12, %cst_10 {dimension_numbers = #tpu.dot_dimension_numbers<[1], [0], [0], [1], [0, 0, 1, 1], [], []>, precision = #tpu.contract_precision<fp32>} : vector<128x16xf32>, vector<16x256xf32>, vector<128x256xf32> -> vector<128x256xf32>
    %14 = vector.shape_cast %13 : vector<128x256xf32> to vector<8x16x256xf32>
    %15 = arith.mulf %10, %14 : vector<8x16x256xf32>
    %cst_11 = arith.constant dense<0.000000e+00> : vector<8x256xf32>
    %16 = vector.multi_reduction <add>, %15, %cst_11 [1] : vector<8x16x256xf32> to vector<8x256xf32>
    %c0_12 = arith.constant 0 : index
    %c0_13 = arith.constant 0 : index
    %17 = vector.load %arg5[%c0_12, %c0_13] : memref<8x256xf32, #tpu.memory_space<vmem>>, vector<8x256xf32>
    tpu.vector_store %arg5[%c0_12, %c0_13], %16 {strides = array<i32>} : memref<8x256xf32, #tpu.memory_space<vmem>>, vector<8x256xf32>,
    return
  }
  func.func @transform_0(%arg0: i32) -> (i32, i32, i32) {
    %c0_i32 = arith.constant 0 : i32
    %c0_i32_0 = arith.constant 0 : i32
    %c0_i32_1 = arith.constant 0 : i32
    return %arg0, %c0_i32, %c0_i32_0 : i32, i32, i32
  }
  func.func @transform_1(%arg0: i32) -> (i32, i32, i32) {
    %c0_i32 = arith.constant 0 : i32
    %c0_i32_0 = arith.constant 0 : i32
    %c0_i32_1 = arith.constant 0 : i32
    return %arg0, %c0_i32, %c0_i32_0 : i32, i32, i32
  }
  func.func @transform_2(%arg0: i32) -> (i32, i32) {
    %c0_i32 = arith.constant 0 : i32
    %c0_i32_0 = arith.constant 0 : i32
    %c0_i32_1 = arith.constant 0 : i32
    return %c0_i32, %c0_i32_0 : i32, i32
  }
  func.func @transform_3(%arg0: i32) -> (i32, i32) {
    %c0_i32 = arith.constant 0 : i32
    %c0_i32_0 = arith.constant 0 : i32
    %c0_i32_1 = arith.constant 0 : i32
    return %c0_i32, %c0_i32_0 : i32, i32
  }
  func.func @transform_4(%arg0: i32) -> (i32, i32) {
    %c0_i32 = arith.constant 0 : i32
    %c0_i32_0 = arith.constant 0 : i32
    return %arg0, %c0_i32 : i32, i32
  }
}

</mosaic_0001>

<bundles_post_ra>
// kernel: tpu_custom_call.1
= control target key start
LH: loop header
LB: loop body
LE: loop exit
PB: predicated region body
PF: predicated region fallthrough
CT: control target
= control target key end

     0   :  { %9 = vsyncpa [#allocation3], 0  ;;  %s4958_s0 = inlined_call_operand.vmem [shape: f32[16,16,1], index: 0, kind: input, shape index: {}]   ;;  %s4959_s1 = inlined_call_operand.vmem [shape: f32[16,16,16], index: 1, kind: input, shape index: {}]   ;;  %s4960_s2 = inlined_call_operand.hbm [shape: f32[16,256], index: 2, kind: input, shape index: {}]   ;;  %s4961_s3 = inlined_call_operand.hbm [shape: f32[16,256], index: 3, kind: input, shape index: {}]   ;;  %s4962_s4 = inlined_call_operand.hbm [shape: f32[16,256], index: 4, kind: output, shape index: {}]  }
   0x1   :  { %10 = vsyncpa [#allocation6], 0 }
   0x2   :  { %11 = vsyncpa [#allocation4], 0 }
   0x3   :  { %13 = vsyncpa [#allocation4 + $0x1], 0  ;;  %s3631_s15 = smov 0   ;;  %s3633_s16 = smov 0  }
   0x4   :  { %s3635_s17 = smov 0   ;;  %s3637_s18 = smov 0  }
   0x5 LB: > { %s3652_s19 = sadd.s32 4294967295, %s3599_s18   ;;  %s3332_s20 = sadd.s32 4294967294, %s3599_s18   ;;  %s3599_s18 = sphi %s3637_s18, %s5129_s18   ;;  %s3595_s17 = sphi %s3635_s17, %s5128_s17   ;;  %s3591_s16 = sphi %s3633_s16, %s5127_s16   ;;  %s3587_s15 = sphi %s3631_s15, %s5126_s15  }
   0x6   : > { %s3656_s21 = sadd.s32 1, %s3599_s18   ;;  %s120_s22 = sadd.s32 1, %s3595_s17 }
   0x7   : > { %s117_s23 = ssub.s32 %s3599_s18, %s3656_s21  ;;  %p130_p0 = scmp.ne.s32.totalorder %s3595_s17, %s3591_s16 }
   0x8   : > { %p118_p1 = scmp.eq.s32.totalorder %s117_s23, 0  ;;  %p131_p2 = scmp.eq.s32.totalorder %s3652_s19, 1 }
   0x9   : > { %p136_p3 = scmp.ne.s32.totalorder %s3591_s16, %s3587_s15  ;;  %p137_p4 = scmp.eq.s32.totalorder %s3332_s20, 1 }
   0xa   : > { %s3667_s24 = scalar_select %p118_p1, %s3595_s17, %s120_s22  }
   0xb   : > { %p3669_p5 = por %p131_p2, %p130_p0  ;;  %p3673_p6 = por %p137_p4, %p136_p3 }
   0xc   : > { %p3333_p7 = scmp.ge.s32.totalorder %s3599_s18, 1  ;;  %p144_p8 = scmp.lt.s32.totalorder %s3599_s18, 3 }
   0xd   : > { %p3376_p9 = scmp.eq.s32.totalorder %s3652_s19, 0  ;;  %s155_s30 = sshll.u32 %s4960_s2, 4  ;;  %s156_s30 = int_to_ptr.hbm [resolvable:$true] %s155_s30 }
   0xe   : > { %p3680_p10 = pnand %p3333_p7, %p144_p8  ;;  %s3601_s5 = smov [#allocation2]  }
   0xf   : > { %s157_s6 = sshll.u32 %s3601_s5, 4  ;;  %s169_s9 = sshll.u32 %s4961_s3, 4  ;;  %s158_s6 = int_to_ptr.vmem [resolvable:$true] %s157_s6  ;;  %s170_s9 = int_to_ptr.hbm [resolvable:$true] %s169_s9 }
  0x10   : > { %p3365_p11 = pneg %p3680_p10  ;;  %s3602_s10 = smov 256  }
  0x11   : > { %s3603_s11 = smov 16   ;;  %s3604_s12 = smov [#allocation5]  }
  0x12   : > { %p3366_p12 = pnand %p3376_p9, %p3365_p11  ;;  %s171_s13 = sshll.u32 %s3604_s12, 4  ;;  %s172_s13 = int_to_ptr.vmem [resolvable:$true] %s171_s13 }
  0x13   : > { %207 = sbr.rel (%p3680_p10) target bundleno = 1088 (0x440), region = 36 }
  0x14   : > { %3368 = dma.hbm_to_vmem [thread:$0]  (!%p3366_p12), %s156_s30, 512, %s158_s6, [#allocation3], %s3602_s10, %s3602_s10, %s3603_s11  }
  0x15   : > { %3371 = dma.hbm_to_vmem [thread:$0]  (!%p3366_p12), %s170_s9, 512, %s172_s13, [#allocation6], %s3602_s10, %s3602_s10, %s3603_s11  }
  0x18   : > { %3574 = dma.done.wait (%p3376_p9), [#allocation3], 512  }
  0x19   : > { %3576 = vsyncadd (%p3376_p9), [#allocation3], 4294966784 }
  0x1a   : > { %3578 = dma.done.wait (%p3376_p9), [#allocation6], 512  }
  0x1b   : > { %3580 = vsyncadd (%p3376_p9), [#allocation6], 4294966784  ;;  %s3341_s14 = sshll.u32 %s3652_s19, 3  ;;  %v3605_v0 = vmov 0   ;;  %vm440_vm0 = vcmask 130048   ;;  %vm3197_vm1 = vcmask 1041409  }
  0x1c   : > { %3419 = vset.pattern.permute.xlu1 %v3605_v0  ;;  %3418 = vset.pattern.permute.xlu0 %v3605_v0  ;;  %p247_p13 = scmp.lt.s32.totalorder %s3341_s14, 15  ;;  %vm3199_vm2 = vcmask 1042434   ;;  %vm3201_vm3 = vcmask 1043459   ;;  %vm3203_vm4 = vcmask 1044484   ;;  %vm3205_vm5 = vcmask 1045509   ;;  %s243_s5 = sand.u32 1, %s3591_s16  }
  0x1d   : > { %3420 = vset.pattern.permute.xlu2 %v3605_v0  ;;  %vm3207_vm6 = vcmask 1046534   ;;  %s3340_s6 = sshll.u32 %s243_s5, 4  ;;  %vm3209_vm7 = vcmask 1047559   ;;  %s3354_s8 = sshll.u32 %s3652_s19, 4 }
  0x1e   : > { %s5131_s14 = smov (!%p247_p13, %s3341_s14), 15  ;;  %s4884_s7 = scalar_lea.vmem [#allocation7], %s3340_s6 }
  0x1f   : > { %s3352_s20 = sshll.u32 %s5131_s14, 4  ;;  %s3234_s11 = scalar_lea.hbm %s4962_s4, %s3354_s8 }
  0x20   : > { %s3713_s27 = scalar_lea.vmem %s4958_s0, %s3352_s20  ;;  %s3746_s30 = scalar_lea.vmem %s4959_s1, %s3352_s20 }
  0x21   : > { %v262_v1 = vld [vmem:[%s3713_s27 + $0x10] sm:$0xff]  ;;  %v260_v2 = vld [vmem:[%s3713_s27] sm:$0xff]  ;;  %v263_v3 = vld [vmem:[%s3713_s27 + $0x18] sm:$0xff]  ;;  %s3236_s12 = sshll.u32 %s4884_s7, 4  ;;  %s3238_s13 = sshll.u32 %s3234_s11, 4  ;;  %s3237_s12 = int_to_ptr.vmem [resolvable:$true] %s3236_s12  ;;  %s3239_s13 = int_to_ptr.hbm [resolvable:$true] %s3238_s13 }
  0x22   : > { %v278_v4 = vmax.f32 %v262_v1, 1e-06  ;;  %v276_v5 = vmax.f32 %v260_v2, 1e-06  ;;  %v261_v6 = vld [vmem:[%s3713_s27 + $0x8] sm:$0xff]  ;;  %v264_v9 = vld [vmem:[%s3713_s27 + $0x20] sm:$0xff] }
  0x23   : > { %v279_v7 = vmax.f32 %v263_v3, 1e-06  ;;  %v277_v8 = vmax.f32 %v261_v6, 1e-06  ;;  %v280_v10 = vmax.f32 %v264_v9, 1e-06 }
  0x24   : > { %3421 = vlog2.f32 %v278_v4  ;;  %v265_v11 = vld [vmem:[%s3713_s27 + $0x28] sm:$0xff]  ;;  %v267_v12 = vld [vmem:[%s3713_s27 + $0x38] sm:$0xff]  ;;  %v266_v14 = vld [vmem:[%s3713_s27 + $0x30] sm:$0xff]  ;;  %s3223_s14 = scalar_lea.sflag [#allocation4], %s243_s5  ;;  %s3543_s20 = sshra.s32 %s3239_s13, 4  ;;  %s3544_s20 = int_to_ptr.hbm [resolvable:$true] %s3543_s20 }
  0x25   : > { %3423 = vlog2.f32 %v276_v5  ;;  %v281_v15 = vmax.f32 %v265_v11, 1e-06  ;;  %v283_v19 = vmax.f32 %v267_v12, 1e-06  ;;  %v282_v20 = vmax.f32 %v266_v14, 1e-06  ;;  %p3550_p3 = scmp.lt.s32.totalorder %s3544_s20, %s4962_s4 }
  0x26   : > { %3425 = vlog2.f32 %v279_v7  ;;  %v268_v23 = vld [vmem:[%s3713_s27 + $0x40] sm:$0xff]  ;;  %v270_v27 = vld [vmem:[%s3713_s27 + $0x50] sm:$0xff]  ;;  %v269_v29 = vld [vmem:[%s3713_s27 + $0x48] sm:$0xff]  ;;  %s3545_s19 = scalar_lea.hbm %s3544_s20, 16 }
  0x27   : > { %3427 = vlog2.f32 %v277_v8  ;;  %v284_v30 = vmax.f32 %v268_v23, 1e-06  ;;  %v286_v32 = vmax.f32 %v270_v27, 1e-06  ;;  %v285_v33 = vmax.f32 %v269_v29, 1e-06  ;;  %p3546_p0 = scmp.ne.s32.totalorder %s3544_s20, %s3545_s19 }
  0x28   : > { %3429 = vlog2.f32 %v280_v10  ;;  %v271_v37 = vld [vmem:[%s3713_s27 + $0x58] sm:$0xff]  ;;  %v273_v39 = vld [vmem:[%s3713_s27 + $0x68] sm:$0xff]  ;;  %v272_v41 = vld [vmem:[%s3713_s27 + $0x60] sm:$0xff] }
  0x29   : > { %3431 = vlog2.f32 %v281_v15  ;;  %v287_v42 = vmax.f32 %v271_v37, 1e-06  ;;  %v289_v44 = vmax.f32 %v273_v39, 1e-06  ;;  %v288_v45 = vmax.f32 %v272_v41, 1e-06  ;;  %p3547_p1 = pnand %p3546_p0, %p3669_p5 }
  0x2a   : > { %v3422_v13 = vpop.eup %3421  ;;  %3433 = vlog2.f32 %v283_v19  ;;  %v274_v49 = vld [vmem:[%s3713_s27 + $0x70] sm:$0xff]  ;;  %v275_v52 = vld [vmem:[%s3713_s27 + $0x78] sm:$0xff]  ;;  %v436_v3 = vld [vmem:[#allocation2] sm:$0xff]  ;;  %s3549_s27 = scalar_lea.hbm %s4962_s4, 32 }
  0x2b   : > { %v3424_v16 = vpop.eup %3423  ;;  %v297_v17 = vmul.f32 0.6931472, %v3422_v13  ;;  %3435 = vlog2.f32 %v282_v20  ;;  %v290_v53 = vmax.f32 %v274_v49, 1e-06  ;;  %v291_v55 = vmax.f32 %v275_v52, 1e-06  ;;  %p3548_p2 = pneg %p3547_p1  ;;  %p3551_p4 = scmp.lt.s32.totalorder %s3549_s27, %s3545_s19 }
  0x2c   : > { %v293_v18 = vmul.f32 0.6931472, %v3424_v16  ;;  %v3426_v21 = vpop.eup %3425  ;;  %3437 = vlog2.f32 %v284_v30  ;;  %v438_v1 = vld [vmem:[#allocation2 + $0x10] sm:$0xff]  ;;  %v505_v5 = vand.u32 4294901760, %v436_v3  ;;  %v439_v13 = vld [vmem:[#allocation2 + $0x18] sm:$0xff]  ;;  %v324_v19 = vld [vmem:[%s3746_s30] sm:$0xff] }
  0x2d   : > { %352 = vperm.xlu1 %3419, %v297_v17   ;;  %v3428_v22 = vpop.eup %3427  ;;  %v299_v25 = vmul.f32 0.6931472, %v3426_v21  ;;  %3439 = vlog2.f32 %v286_v32  ;;  %v503_v2 = vand.u32 4294901760, %v438_v1  ;;  %v3731_v14 = vand.u32 4294901760, %v439_v13  ;;  %p3552_p7 = por %p3551_p4, %p3550_p3 }
  0x2e   : > { %342 = vperm.xlu0 %3418, %v293_v18   ;;  %v3430_v24 = vpop.eup %3429  ;;  %v295_v28 = vmul.f32 0.6931472, %v3428_v22  ;;  %3441 = vlog2.f32 %v285_v33  ;;  %v657_v7 = vsub.f32 %v436_v3, %v505_v5  ;;  %v326_v22 = vld [vmem:[%s3746_s30 + $0x10] sm:$0xff]  ;;  %v327_v33 = vld [vmem:[%s3746_s30 + $0x18] sm:$0xff] }
  0x2f   : > { %v301_v26 = vmul.f32 0.6931472, %v3430_v24  ;;  %v3432_v31 = vpop.eup %3431  ;;  %3443 = vlog2.f32 %v287_v42  ;;  %v651_v4 = vsub.f32 %v438_v1, %v503_v2  ;;  %843 = vmatpush.msra.mxu3 %v503_v2  ;;  %504 = vmatpush.msra.mxu0 %v503_v2  ;;  %v3735_v15 = vsub.f32 %v439_v13, %v3731_v14  ;;  %p3553_p8 = pnand %p3552_p7, %p3548_p2 }
  0x30   : > { %v3434_v34 = vpop.eup %3433  ;;  %v303_v36 = vmul.f32 0.6931472, %v3432_v31  ;;  %3445 = vlog2.f32 %v289_v44  ;;  %v658_v9 = vand.u32 4294901760, %v657_v7 }
  0x31   : > { %362 = vperm.xlu2 %3420, %v301_v26   ;;  %v3436_v35 = vpop.eup %3435  ;;  %v307_v38 = vmul.f32 0.6931472, %v3434_v34  ;;  %3447 = vlog2.f32 %v288_v45  ;;  %v652_v6 = vand.u32 4294901760, %v651_v4  ;;  %743 = vmatpush.msra.mxu2 %v651_v4  ;;  %v1276_v16 = vand.u32 4294901760, %v3735_v15  ;;  %v328_v45 = vld [vmem:[%s3746_s30 + $0x20] sm:$0xff] }
  0x32   : > { %v305_v40 = vmul.f32 0.6931472, %v3436_v35  ;;  %v3438_v43 = vpop.eup %3437  ;;  %3449 = vlog2.f32 %v290_v53  ;;  %845 = vmatpush.msra.mxu3 %v505_v5  ;;  %506 = vmatpush.msra.mxu0 %v505_v5  ;;  %v659_v11 = vsub.f32 %v657_v7, %v658_v9 }
  0x33   : > { %v3440_v46 = vpop.eup %3439  ;;  %v309_v48 = vmul.f32 0.6931472, %v3438_v43  ;;  %3451 = vlog2.f32 %v291_v55  ;;  %v653_v8 = vsub.f32 %v651_v4, %v652_v6  ;;  %746 = vmatpush.msra.mxu2 %v657_v7  ;;  %v1277_v17 = vsub.f32 %v3735_v15, %v1276_v16  ;;  %v329_v55 = vld [vmem:[%s3746_s30 + $0x28] sm:$0xff] }
  0x34   : > { %v3442_v47 = vpop.eup %3441  ;;  %v313_v50 = vmul.f32 0.6931472, %v3440_v46  ;;  %960 = vmatpush.msrb.mxu0 %v652_v6  ;;  %v660_v12 = vand.u32 4294901760, %v659_v11  ;;  %v437_v11 = vld [vmem:[#allocation2 + $0x8] sm:$0xff] }
  0x35   : > { %357 = vperm.xlu1 %3419, %v299_v25   ;;  %v311_v51 = vmul.f32 0.6931472, %v3442_v47  ;;  %v3444_v54 = vpop.eup %3443  ;;  %v654_v10 = vand.u32 4294901760, %v653_v8  ;;  %1128 = vmatpush.msrb.mxu2 %v3731_v14  ;;  %v1278_v18 = vand.u32 4294901760, %v1277_v17 }
  0x36   : > { %347 = vperm.xlu0 %3418, %v295_v28   ;;  %v3446_v56 = vpop.eup %3445  ;;  %v315_v58 = vmul.f32 0.6931472, %v3444_v54  ;;  %964 = vmatpush.msrb.mxu0 %v658_v9  ;;  %v325_v28 = vld [vmem:[%s3746_s30 + $0x8] sm:$0xff]  ;;  %v331_v9 = vld [vmem:[%s3746_s30 + $0x38] sm:$0xff] }
  0x37   : > { %v3448_v57 = vpop.eup %3447  ;;  %v319_v59 = vmul.f32 0.6931472, %v3446_v56  ;;  %655 = vmatpush.msra.mxu1 %v654_v10  ;;  %1279 = vmatpush.msrb.mxu3 %v1278_v18 }
  0x38   : > { %v317_v60 = vmul.f32 0.6931472, %v3448_v57  ;;  %v3450_v61 = vpop.eup %3449 }
  0x39   : > { %367 = vperm.xlu2 %3420, %v303_v36   ;;  %v3452_v62 = vpop.eup %3451  ;;  %v321_v63 = vmul.f32 0.6931472, %v3450_v61  ;;  %661 = vmatpush.msra.mxu1 %v660_v12  ;;  %v1129_v12 = vand.u32 4294901760, %v437_v11 }
  0x3a   : > { %v323_v0 = vmul.f32 0.6931472, %v3452_v62 }
  0x3b   : > { %1045 = vmatpush.msrb.mxu1 %v503_v2  ;;  %1130 = vmatpush.msrb.mxu2 %v1129_v12 }
  0x3d   : > { %377 = vperm.xlu1 %3419, %v307_v38   ;;  %1047 = vmatpush.msrb.mxu1 %v505_v5 }
  0x3e   : > { %372 = vperm.xlu0 %3418, %v305_v40  }
  0x41   : > { %382 = vperm.xlu2 %3420, %v309_v48  }
  0x45   : > { %392 = vperm.xlu1 %3419, %v313_v50  }
  0x46   : > { %387 = vperm.xlu0 %3418, %v311_v51  }
  0x49   : > { %397 = vperm.xlu2 %3420, %v315_v58  }
  0x4d   : > { %407 = vperm.xlu1 %3419, %v319_v59  }
  0x4e   : > { %402 = vperm.xlu0 %3418, %v317_v60  }
  0x51   : > { %412 = vperm.xlu2 %3420, %v321_v63  }
  0x56   : > { %417 = vperm.xlu0 %3418, %v323_v0   ;;  %v330_v0 = vld [vmem:[%s3746_s30 + $0x30] sm:$0xff] }
  0x8b   : > { %v363_v46 = vpop.permute.xlu2 %362 }
  0x8c   : > { %v424_v51 = vmul.f32 %v363_v46, %v328_v45 }
  0x8e   : > { %v454_v54 = vsel %vm440_vm0, %v424_v51, 0 }
  0x8f   : > { %v3811_v56 = vand.u32 4294901760, %v454_v54 }
  0x91   : > { %v3821_v61 = vsub.f32 %v454_v54, %v3811_v56 }
  0x93   : > { %v368_v57 = vpop.permute.xlu2 %367  ;;  %v3834_v4 = vand.u32 4294901760, %v3821_v61 }
  0x94   : > { %v425_v60 = vmul.f32 %v368_v57, %v329_v55  ;;  %v334_v55 = vld [vmem:[%s3746_s30 + $0x50] sm:$0xff] }
  0x95   : > { %v542_v7 = vsub.f32 %v3821_v61, %v3834_v4 }
  0x96   : > { %v457_v63 = vsel %vm440_vm0, %v425_v60, 0 }
  0x97   : > { %v3829_v2 = vand.u32 4294901760, %v457_v63  ;;  %v3849_v17 = vand.u32 4294901760, %v542_v7 }
  0x99   : > { %v3839_v6 = vsub.f32 %v457_v63, %v3829_v2 }
  0x9b   : > { %v3852_v18 = vand.u32 4294901760, %v3839_v6 }
  0x9f   : > { %v353_v23 = vpop.permute.xlu1 %352 }
  0xa0   : > { %v343_v20 = vpop.permute.xlu0 %342  ;;  %v422_v26 = vmul.f32 %v353_v23, %v326_v22  ;;  %v550_v22 = vsub.f32 %v3839_v6, %v3852_v18 }
  0xa1   : > { %v420_v21 = vmul.f32 %v343_v20, %v324_v19  ;;  %v1281_v20 = vsub.f32 %v437_v11, %v1129_v12 }
  0xa2   : > { %v448_v31 = vsel %vm440_vm0, %v422_v26, 0  ;;  %v332_v26 = vld [vmem:[%s3746_s30 + $0x40] sm:$0xff] }
  0xa3   : > { %v442_v24 = vsel %vm440_vm0, %v420_v21, 0  ;;  %v3769_v36 = vand.u32 4294901760, %v448_v31  ;;  %v1282_v23 = vand.u32 4294901760, %v1281_v20 }
  0xa4   : > { %v3751_v25 = vand.u32 4294901760, %v442_v24 }
  0xa5   : > { %v3782_v42 = vsub.f32 %v448_v31, %v3769_v36 }
  0xa6   : > { %v3754_v27 = vsub.f32 %v442_v24, %v3751_v25  ;;  %663 = vmatmul.f32.vlgmr.msra.gmra.mxu1 %v3751_v25 }
  0xa7   : > { %1467 = vmatpush.msra.mxu1 %v3731_v14  ;;  %v358_v37 = vpop.permute.xlu1 %357  ;;  %v3798_v50 = vand.u32 4294901760, %v3782_v42 }
  0xa8   : > { %749 = vmatmul.f32.vlgmr.msra.gmra.mxu2 %v3754_v27  ;;  %v348_v29 = vpop.permute.xlu0 %347  ;;  %v3761_v30 = vand.u32 4294901760, %v3754_v27  ;;  %v423_v40 = vmul.f32 %v358_v37, %v327_v33 }
  0xa9   : > { %v421_v32 = vmul.f32 %v348_v29, %v325_v28  ;;  %v526_v53 = vsub.f32 %v3782_v42, %v3798_v50  ;;  %1469 = vmatpush.msra.mxu1 %v1129_v12  ;;  %1584 = vmatpush.msra.mxu2 %v1276_v16  ;;  %v1283_v28 = vsub.f32 %v1281_v20, %v1282_v23  ;;  %v3869_v29 = vand.u32 4294901760, %v550_v22 }
  0xaa   : > { %849 = vmatmul.f32.vlgmr.msra.gmra.mxu3 %v3761_v30  ;;  %v510_v34 = vsub.f32 %v3754_v27, %v3761_v30  ;;  %v451_v44 = vsel %vm440_vm0, %v423_v40, 0  ;;  %v333_v40 = vld [vmem:[%s3746_s30 + $0x48] sm:$0xff] }
  0xab   : > { %v445_v35 = vsel %vm440_vm0, %v421_v32, 0  ;;  %v3793_v48 = vand.u32 4294901760, %v451_v44  ;;  %v3813_v58 = vand.u32 4294901760, %v526_v53  ;;  %1588 = vmatpush.msra.mxu2 %v1282_v23  ;;  %v1284_v32 = vand.u32 4294901760, %v1283_v28 }
  0xac   : > { %v3771_v38 = vand.u32 4294901760, %v445_v35  ;;  %v3773_v39 = vand.u32 4294901760, %v510_v34 }
  0xad   : > { %v3803_v52 = vsub.f32 %v451_v44, %v3793_v48  ;;  %1285 = vmatpush.msrb.mxu3 %v1284_v32 }
  0xae   : > { %v3776_v41 = vsub.f32 %v445_v35, %v3771_v38  ;;  %512 = vmatmul.f32.vlgmr.msra.gmra.mxu0 %v3773_v39  ;;  %667 = vmatmul.f32.gmra.mxu1 %v3771_v38 }
  0xaf   : > { %1367 = vmatpush.msra.mxu0 %v3735_v15  ;;  %v3816_v59 = vand.u32 4294901760, %v3803_v52  ;;  %v378_v10 = vpop.permute.xlu1 %377  ;;  %v383_v15 = vpop.permute.xlu2 %382  ;;  %1669 = vmatpush.msra.mxu3 %v3731_v14 }
  0xb0   : > { %754 = vmatmul.f32.gmra.mxu2 %v3776_v41  ;;  %v3786_v43 = vand.u32 4294901760, %v3776_v41  ;;  %v373_v1 = vpop.permute.xlu0 %372  ;;  %v427_v19 = vmul.f32 %v378_v10, %v331_v9  ;;  %v428_v33 = vmul.f32 %v383_v15, %v332_v26 }
  0xb1   : > { %v534_v62 = vsub.f32 %v3803_v52, %v3816_v59  ;;  %v426_v5 = vmul.f32 %v373_v1, %v330_v0  ;;  %1370 = vmatpush.msra.mxu0 %v1281_v20  ;;  %1671 = vmatpush.msra.mxu3 %v1129_v12 }
  0xb2   : > { %855 = vmatmul.f32.gmra.mxu3 %v3786_v43  ;;  %v518_v47 = vsub.f32 %v3776_v41, %v3786_v43  ;;  %v463_v24 = vsel %vm440_vm0, %v427_v19, 0  ;;  %v466_v37 = vsel %vm440_vm0, %v428_v33, 0 }
  0xb3   : > { %v3831_v3 = vand.u32 4294901760, %v534_v62  ;;  %v460_v8 = vsel %vm440_vm0, %v426_v5, 0  ;;  %v3867_v16 = vand.u32 4294901760, %v463_v24  ;;  %v3886_v45 = vand.u32 4294901760, %v466_v37 }
  0xb4   : > { %v3795_v49 = vand.u32 4294901760, %v518_v47  ;;  %v3847_v13 = vand.u32 4294901760, %v460_v8 }
  0xb5   : > { %v3877_v34 = vsub.f32 %v463_v24, %v3867_v16  ;;  %v3896_v14 = vsub.f32 %v466_v37, %v3886_v45  ;;  %v336_v24 = vld [vmem:[%s3746_s30 + $0x60] sm:$0xff] }
  0xb6   : > { %520 = vmatmul.f32.gmra.mxu0 %v3795_v49  ;;  %671 = vmatmul.f32.gmra.mxu1 %v3769_v36  ;;  %v3859_v21 = vsub.f32 %v460_v8, %v3847_v13  ;;  %v335_v8 = vld [vmem:[%s3746_s30 + $0x58] sm:$0xff] }
  0xb7   : > { %v3891_v47 = vand.u32 4294901760, %v3877_v34  ;;  %v393_v57 = vpop.permute.xlu1 %392  ;;  %v3909_v63 = vand.u32 4294901760, %v3896_v14  ;;  %v398_v9 = vpop.permute.xlu2 %397 }
  0xb8   : > { %759 = vmatmul.f32.gmra.mxu2 %v3782_v42  ;;  %v3872_v31 = vand.u32 4294901760, %v3859_v21  ;;  %v388_v44 = vpop.permute.xlu0 %387  ;;  %v430_v0 = vmul.f32 %v393_v57, %v334_v55  ;;  %v431_v19 = vmul.f32 %v398_v9, %v335_v8  ;;  %v338_v8 = vld [vmem:[%s3746_s30 + $0x70] sm:$0xff] }
  0xb9   : > { %v429_v51 = vmul.f32 %v388_v44, %v333_v40  ;;  %v566_v53 = vsub.f32 %v3877_v34, %v3891_v47  ;;  %v574_v5 = vsub.f32 %v3896_v14, %v3909_v63  ;;  %v337_v44 = vld [vmem:[%s3746_s30 + $0x68] sm:$0xff] }
  0xba   : > { %861 = vmatmul.f32.gmra.mxu3 %v3798_v50  ;;  %v558_v35 = vsub.f32 %v3859_v21, %v3872_v31  ;;  %v472_v7 = vsel %vm440_vm0, %v430_v0, 0  ;;  %v475_v23 = vsel %vm440_vm0, %v431_v19, 0 }
  0xbb   : > { %v469_v54 = vsel %vm440_vm0, %v429_v51, 0  ;;  %v3906_v62 = vand.u32 4294901760, %v566_v53  ;;  %v3922_v10 = vand.u32 4294901760, %v472_v7  ;;  %v3924_v11 = vand.u32 4294901760, %v574_v5 }
  0xbc   : > { %v3888_v46 = vand.u32 4294901760, %v558_v35  ;;  %v3904_v60 = vand.u32 4294901760, %v469_v54  ;;  %v3940_v28 = vand.u32 4294901760, %v475_v23 }
  0xbd   : > { %v3932_v20 = vsub.f32 %v472_v7, %v3922_v10 }
  0xbe   : > { %528 = vmatmul.f32.gmra.mxu0 %v3813_v58  ;;  %675 = vmatmul.f32.gmra.mxu1 %v3793_v48  ;;  %v3914_v1 = vsub.f32 %v469_v54, %v3904_v60  ;;  %v3950_v35 = vsub.f32 %v475_v23, %v3940_v28 }
  0xbf   : > { %5002 = vst [vmem:[#allocation12_spill] sm:$0xff] %v3932_v20  ;;  %v3945_v32 = vand.u32 4294901760, %v3932_v20  ;;  %v408_v51 = vpop.permute.xlu1 %407  ;;  %v413_v9 = vpop.permute.xlu2 %412 }
  0xc0   : > { %764 = vmatmul.f32.gmra.mxu2 %v3803_v52  ;;  %5001 = vst [vmem:[#allocation11_spill] sm:$0xff] %v3914_v1  ;;  %v3927_v12 = vand.u32 4294901760, %v3914_v1  ;;  %v403_v26 = vpop.permute.xlu0 %402  ;;  %v3963_v55 = vand.u32 4294901760, %v3950_v35  ;;  %v433_v57 = vmul.f32 %v408_v51, %v337_v44 }
  0xc1   : > { %5003 = vst [vmem:[#allocation13_spill] sm:$0xff] %v3945_v32  ;;  %v432_v33 = vmul.f32 %v403_v26, %v336_v24  ;;  %v590_v37 = vsub.f32 %v3932_v20, %v3945_v32  ;;  %v434_v24 = vmul.f32 %v413_v9, %v338_v8 }
  0xc2   : > { %867 = vmatmul.f32.gmra.mxu3 %v3816_v59  ;;  %v582_v22 = vsub.f32 %v3914_v1, %v3927_v12  ;;  %5004 = vst [vmem:[#allocation14_spill] sm:$0xff] %v3950_v35  ;;  %v598_v5 = vsub.f32 %v3950_v35, %v3963_v55  ;;  %v481_v7 = vsel %vm440_vm0, %v433_v57, 0 }
  0xc3   : > { %v478_v40 = vsel %vm440_vm0, %v432_v33, 0  ;;  %v3960_v54 = vand.u32 4294901760, %v590_v37  ;;  %5006 = vst [vmem:[#allocation16_spill] sm:$0xff] %v3963_v55  ;;  %v3976_v19 = vand.u32 4294901760, %v481_v7  ;;  %v484_v37 = vsel %vm440_vm0, %v434_v24, 0 }
  0xc4   : > { %v3942_v15 = vand.u32 4294901760, %v582_v22  ;;  %v3958_v53 = vand.u32 4294901760, %v478_v40  ;;  %v3978_v22 = vand.u32 4294901760, %v598_v5  ;;  %v3994_v51 = vand.u32 4294901760, %v484_v37 }
  0xc5   : > { %v3986_v26 = vsub.f32 %v481_v7, %v3976_v19 }
  0xc6   : > { %536 = vmatmul.f32.gmra.mxu0 %v3831_v3  ;;  %679 = vmatmul.f32.gmra.mxu1 %v3811_v56  ;;  %5005 = vst [vmem:[#allocation15_spill] sm:$0xff] %v3958_v53  ;;  %v3968_v0 = vsub.f32 %v478_v40, %v3958_v53  ;;  %v339_v40 = vld [vmem:[%s3746_s30 + $0x78] sm:$0xff]  ;;  %v4004_v8 = vsub.f32 %v484_v37, %v3994_v51 }
  0xc7   : > { %5009 = vst [vmem:[#allocation19_spill] sm:$0xff] %v3986_v26  ;;  %v3999_v5 = vand.u32 4294901760, %v3986_v26 }
  0xc8   : > { %769 = vmatmul.f32.gmra.mxu2 %v3821_v61  ;;  %5007 = vst [vmem:[#allocation17_spill] sm:$0xff] %v3968_v0  ;;  %v3981_v23 = vand.u32 4294901760, %v3968_v0  ;;  %v418_v44 = vpop.permute.xlu0 %417 }
  0xc9   : > { %5010 = vst [vmem:[#allocation20_spill] sm:$0xff] %v3999_v5  ;;  %v435_v7 = vmul.f32 %v418_v44, %v339_v40  ;;  %v614_v9 = vsub.f32 %v3986_v26, %v3999_v5  ;;  %v4016_v40 = vand.u32 4294901760, %v4004_v8 }
  0xca   : > { %873 = vmatmul.f32.gmra.mxu3 %v3834_v4  ;;  %5008 = vst [vmem:[#allocation18_spill] sm:$0xff] %v3981_v23  ;;  %v606_v33 = vsub.f32 %v3968_v0, %v3981_v23 }
  0xcb   : > { %5011 = vst [vmem:[#allocation21_spill] sm:$0xff] %v4004_v8  ;;  %v487_v24 = vsel %vm440_vm0, %v435_v7, 0  ;;  %v622_v44 = vsub.f32 %v4004_v8, %v4016_v40 }
  0xcc   : > { %v3996_v57 = vand.u32 4294901760, %v606_v33  ;;  %v4011_v33 = vand.u32 4294901760, %v487_v24  ;;  %5012 = vst [vmem:[#allocation22_spill] sm:$0xff] %v4016_v40 }
  0xcd   : > { %v4027_v7 = vand.u32 4294901760, %v622_v44 }
  0xce   : > { %544 = vmatmul.f32.gmra.mxu0 %v3849_v17  ;;  %683 = vmatmul.f32.gmra.mxu1 %v3829_v2  ;;  %v4021_v37 = vsub.f32 %v487_v24, %v4011_v33 }
  0xd0   : > { %774 = vmatmul.f32.gmra.mxu2 %v3839_v6  ;;  %5013 = vst [vmem:[#allocation23_spill] sm:$0xff] %v4021_v37 }
  0xd2   : > { %879 = vmatmul.f32.gmra.mxu3 %v3852_v18 }
  0xd6   : > { %552 = vmatmul.f32.gmra.mxu0 %v3869_v29  ;;  %687 = vmatmul.f32.gmra.mxu1 %v3847_v13 }
  0xd8   : > { %779 = vmatmul.f32.gmra.mxu2 %v3859_v21 }
  0xda   : > { %885 = vmatmul.f32.gmra.mxu3 %v3872_v31 }
  0xde   : > { %560 = vmatmul.f32.gmra.mxu0 %v3888_v46  ;;  %691 = vmatmul.f32.gmra.mxu1 %v3867_v16 }
  0xe0   : > { %784 = vmatmul.f32.gmra.mxu2 %v3877_v34 }
  0xe2   : > { %891 = vmatmul.f32.gmra.mxu3 %v3891_v47 }
  0xe6   : > { %568 = vmatmul.f32.gmra.mxu0 %v3906_v62  ;;  %695 = vmatmul.f32.gmra.mxu1 %v3886_v45 }
  0xe8   : > { %789 = vmatmul.f32.gmra.mxu2 %v3896_v14 }
  0xea   : > { %897 = vmatmul.f32.gmra.mxu3 %v3909_v63 }
  0xee   : > { %576 = vmatmul.f32.gmra.mxu0 %v3924_v11  ;;  %699 = vmatmul.f32.gmra.mxu1 %v3904_v60 }
  0xf0   : > { %794 = vmatmul.f32.gmra.mxu2 %v3914_v1 }
  0xf2   : > { %903 = vmatmul.f32.gmra.mxu3 %v3927_v12 }
  0xf6   : > { %584 = vmatmul.f32.gmra.mxu0 %v3942_v15  ;;  %703 = vmatmul.f32.gmra.mxu1 %v3922_v10 }
  0xf8   : > { %799 = vmatmul.f32.gmra.mxu2 %v3932_v20 }
  0xfa   : > { %909 = vmatmul.f32.gmra.mxu3 %v3945_v32 }
  0xfe   : > { %592 = vmatmul.f32.gmra.mxu0 %v3960_v54  ;;  %707 = vmatmul.f32.gmra.mxu1 %v3940_v28 }
 0x100   : > { %804 = vmatmul.f32.gmra.mxu2 %v3950_v35 }
 0x102   : > { %915 = vmatmul.f32.gmra.mxu3 %v3963_v55 }
 0x106   : > { %600 = vmatmul.f32.gmra.mxu0 %v3978_v22  ;;  %711 = vmatmul.f32.gmra.mxu1 %v3958_v53 }
 0x108   : > { %809 = vmatmul.f32.gmra.mxu2 %v3968_v0  ;;  %v4013_v0 = vand.u32 4294901760, %v614_v9  ;;  %v4030_v9 = vand.u32 4294901760, %v4021_v37 }
 0x10a   : > { %921 = vmatmul.f32.gmra.mxu3 %v3981_v23  ;;  %5014 = vst [vmem:[#allocation24_spill] sm:$0xff] %v4030_v9  ;;  %v630_v24 = vsub.f32 %v4021_v37, %v4030_v9 }
 0x10e   : > { %608 = vmatmul.f32.gmra.mxu0 %v3996_v57  ;;  %715 = vmatmul.f32.gmra.mxu1 %v3976_v19 }
 0x110   : > { %814 = vmatmul.f32.gmra.mxu2 %v3986_v26 }
 0x112   : > { %927 = vmatmul.f32.gmra.mxu3 %v3999_v5 }
 0x116   : > { %616 = vmatmul.f32.gmra.mxu0 %v4013_v0  ;;  %719 = vmatmul.f32.gmra.mxu1 %v3994_v51 }
 0x118   : > { %819 = vmatmul.f32.gmra.mxu2 %v4004_v8  ;;  %v4038_v8 = vand.u32 4294901760, %v630_v24 }
 0x11a   : > { %933 = vmatmul.f32.gmra.mxu3 %v4016_v40 }
 0x11e   : > { %624 = vmatmul.f32.gmra.mxu0 %v4027_v7  ;;  %723 = vmatmul.f32.gmra.mxu1 %v4011_v33 }
 0x120   : > { %824 = vmatmul.f32.gmra.mxu2 %v4021_v37 }
 0x122   : > { %939 = vmatmul.f32.gmra.mxu3 %v4030_v9 }
 0x123   : > { %v664_v26 = vpop.f32.mrf.mxu1 }
 0x126   : > { %632 = vmatmul.f32.gmra.mxu0 %v4038_v8  ;;  %1049 = vmatmul.f32.vlgmr.msrb.gmra.mxu1 %v3751_v25 }
 0x128   : > { %1136 = vmatmul.f32.vlgmr.msrb.gmra.mxu2 %v3773_v39 }
 0x12a   : > { %1287 = vmatmul.f32.vlgmr.msrb.gmra.mxu3 %v3751_v25 }
 0x12b   : > { %v513_v44 = vpop.f32.mrf.mxu0  ;;  %v668_v40 = vpop.f32.mrf.mxu1 }
 0x12c   : > { %v665_v5 = vadd.f32 %v664_v26, %v513_v44  ;;  %v750_v23 = vpop.f32.mrf.mxu2 }
 0x12d   : > { %v850_v35 = vpop.f32.mrf.mxu3 }
 0x12e   : > { %v751_v55 = vadd.f32 %v750_v23, %v665_v5  ;;  %966 = vmatmul.f32.vlgmr.msrb.gmra.mxu0 %v3751_v25  ;;  %1053 = vmatmul.f32.gmra.mxu1 %v3771_v38 }
 0x130   : > { %v4046_v24 = vadd.f32 %v850_v35, %v751_v55  ;;  %1144 = vmatmul.f32.gmra.mxu2 %v3795_v49 }
 0x132   : > { %1291 = vmatmul.f32.gmra.mxu3 %v3771_v38 }
 0x133   : > { %v521_v37 = vpop.f32.mrf.mxu0  ;;  %v672_v39 = vpop.f32.mrf.mxu1 }
 0x134   : > { %v669_v9 = vadd.f32 %v668_v40, %v521_v37  ;;  %v755_v20 = vpop.f32.mrf.mxu2 }
 0x135   : > { %v856_v32 = vpop.f32.mrf.mxu3 }
 0x136   : > { %v756_v1 = vadd.f32 %v755_v20, %v669_v9  ;;  %970 = vmatmul.f32.gmra.mxu0 %v3771_v38  ;;  %1057 = vmatmul.f32.gmra.mxu1 %v3769_v36 }
 0x138   : > { %v4052_v23 = vadd.f32 %v856_v32, %v756_v1  ;;  %1152 = vmatmul.f32.gmra.mxu2 %v3813_v58 }
 0x13a   : > { %1295 = vmatmul.f32.gmra.mxu3 %v3769_v36 }
 0x13b   : > { %v529_v35 = vpop.f32.mrf.mxu0  ;;  %v676_v49 = vpop.f32.mrf.mxu1 }
 0x13c   : > { %v673_v55 = vadd.f32 %v672_v39, %v529_v35  ;;  %v760_v26 = vpop.f32.mrf.mxu2 }
 0x13d   : > { %v862_v5 = vpop.f32.mrf.mxu3 }
 0x13e   : > { %v761_v44 = vadd.f32 %v760_v26, %v673_v55  ;;  %974 = vmatmul.f32.gmra.mxu0 %v3769_v36  ;;  %1061 = vmatmul.f32.gmra.mxu1 %v3793_v48 }
 0x140   : > { %v4058_v20 = vadd.f32 %v862_v5, %v761_v44  ;;  %1160 = vmatmul.f32.gmra.mxu2 %v3831_v3 }
 0x142   : > { %1299 = vmatmul.f32.gmra.mxu3 %v3793_v48 }
 0x143   : > { %v537_v1 = vpop.f32.mrf.mxu0  ;;  %v680_v58 = vpop.f32.mrf.mxu1 }
 0x144   : > { %v677_v32 = vadd.f32 %v676_v49, %v537_v1  ;;  %v765_v40 = vpop.f32.mrf.mxu2 }
 0x145   : > { %v868_v37 = vpop.f32.mrf.mxu3 }
 0x146   : > { %v766_v9 = vadd.f32 %v765_v40, %v677_v32  ;;  %978 = vmatmul.f32.gmra.mxu0 %v3793_v48  ;;  %1065 = vmatmul.f32.gmra.mxu1 %v3811_v56 }
 0x148   : > { %v4064_v39 = vadd.f32 %v868_v37, %v766_v9  ;;  %1168 = vmatmul.f32.gmra.mxu2 %v3849_v17 }
 0x14a   : > { %1303 = vmatmul.f32.gmra.mxu3 %v3811_v56 }
 0x14b   : > { %v545_v35 = vpop.f32.mrf.mxu0  ;;  %v684_v3 = vpop.f32.mrf.mxu1 }
 0x14c   : > { %v681_v55 = vadd.f32 %v680_v58, %v545_v35  ;;  %v770_v26 = vpop.f32.mrf.mxu2 }
 0x14d   : > { %v874_v5 = vpop.f32.mrf.mxu3 }
 0x14e   : > { %v771_v44 = vadd.f32 %v770_v26, %v681_v55  ;;  %982 = vmatmul.f32.gmra.mxu0 %v3811_v56  ;;  %1069 = vmatmul.f32.gmra.mxu1 %v3829_v2 }
 0x150   : > { %v4070_v49 = vadd.f32 %v874_v5, %v771_v44  ;;  %1176 = vmatmul.f32.gmra.mxu2 %v3869_v29 }
 0x152   : > { %1307 = vmatmul.f32.gmra.mxu3 %v3829_v2 }
 0x153   : > { %v553_v1 = vpop.f32.mrf.mxu0  ;;  %v688_v17 = vpop.f32.mrf.mxu1 }
 0x154   : > { %v685_v32 = vadd.f32 %v684_v3, %v553_v1  ;;  %v775_v40 = vpop.f32.mrf.mxu2 }
 0x155   : > { %v880_v37 = vpop.f32.mrf.mxu3 }
 0x156   : > { %v776_v9 = vadd.f32 %v775_v40, %v685_v32  ;;  %986 = vmatmul.f32.gmra.mxu0 %v3829_v2  ;;  %1073 = vmatmul.f32.gmra.mxu1 %v3847_v13 }
 0x158   : > { %v4076_v58 = vadd.f32 %v880_v37, %v776_v9  ;;  %1184 = vmatmul.f32.gmra.mxu2 %v3888_v46 }
 0x15a   : > { %1311 = vmatmul.f32.gmra.mxu3 %v3847_v13 }
 0x15b   : > { %v561_v35 = vpop.f32.mrf.mxu0  ;;  %v692_v29 = vpop.f32.mrf.mxu1 }
 0x15c   : > { %v689_v55 = vadd.f32 %v688_v17, %v561_v35  ;;  %v780_v26 = vpop.f32.mrf.mxu2 }
 0x15d   : > { %v886_v5 = vpop.f32.mrf.mxu3 }
 0x15e   : > { %v781_v44 = vadd.f32 %v780_v26, %v689_v55  ;;  %990 = vmatmul.f32.gmra.mxu0 %v3847_v13  ;;  %1077 = vmatmul.f32.gmra.mxu1 %v3867_v16 }
 0x160   : > { %v4082_v3 = vadd.f32 %v886_v5, %v781_v44  ;;  %1192 = vmatmul.f32.gmra.mxu2 %v3906_v62 }
 0x162   : > { %1315 = vmatmul.f32.gmra.mxu3 %v3867_v16 }
 0x163   : > { %v569_v1 = vpop.f32.mrf.mxu0  ;;  %v696_v46 = vpop.f32.mrf.mxu1 }
 0x164   : > { %v693_v32 = vadd.f32 %v692_v29, %v569_v1  ;;  %v785_v40 = vpop.f32.mrf.mxu2 }
 0x165   : > { %v892_v37 = vpop.f32.mrf.mxu3 }
 0x166   : > { %v786_v9 = vadd.f32 %v785_v40, %v693_v32  ;;  %994 = vmatmul.f32.gmra.mxu0 %v3867_v16  ;;  %1081 = vmatmul.f32.gmra.mxu1 %v3886_v45 }
 0x168   : > { %v4088_v17 = vadd.f32 %v892_v37, %v786_v9  ;;  %1200 = vmatmul.f32.gmra.mxu2 %v3924_v11 }
 0x16a   : > { %1319 = vmatmul.f32.gmra.mxu3 %v3886_v45 }
 0x16b   : > { %v577_v35 = vpop.f32.mrf.mxu0  ;;  %v700_v62 = vpop.f32.mrf.mxu1 }
 0x16c   : > { %v697_v55 = vadd.f32 %v696_v46, %v577_v35  ;;  %v790_v26 = vpop.f32.mrf.mxu2 }
 0x16d   : > { %v898_v5 = vpop.f32.mrf.mxu3 }
 0x16e   : > { %v791_v44 = vadd.f32 %v790_v26, %v697_v55  ;;  %998 = vmatmul.f32.gmra.mxu0 %v3886_v45  ;;  %1085 = vmatmul.f32.gmra.mxu1 %v3904_v60 }
 0x170   : > { %v4094_v29 = vadd.f32 %v898_v5, %v791_v44  ;;  %1208 = vmatmul.f32.gmra.mxu2 %v3942_v15 }
 0x172   : > { %1323 = vmatmul.f32.gmra.mxu3 %v3904_v60 }
 0x173   : > { %v585_v1 = vpop.f32.mrf.mxu0  ;;  %v704_v11 = vpop.f32.mrf.mxu1 }
 0x174   : > { %v701_v32 = vadd.f32 %v700_v62, %v585_v1  ;;  %v795_v40 = vpop.f32.mrf.mxu2 }
 0x175   : > { %v904_v37 = vpop.f32.mrf.mxu3 }
 0x176   : > { %v796_v9 = vadd.f32 %v795_v40, %v701_v32  ;;  %1002 = vmatmul.f32.gmra.mxu0 %v3904_v60  ;;  %1089 = vmatmul.f32.gmra.mxu1 %v3922_v10 }
 0x178   : > { %v4100_v46 = vadd.f32 %v904_v37, %v796_v9  ;;  %1216 = vmatmul.f32.gmra.mxu2 %v3960_v54 }
 0x17a   : > { %1327 = vmatmul.f32.gmra.mxu3 %v3922_v10 }
 0x17b   : > { %v593_v35 = vpop.f32.mrf.mxu0  ;;  %v708_v15 = vpop.f32.mrf.mxu1 }
 0x17c   : > { %v705_v55 = vadd.f32 %v704_v11, %v593_v35  ;;  %v800_v26 = vpop.f32.mrf.mxu2 }
 0x17d   : > { %v910_v5 = vpop.f32.mrf.mxu3 }
 0x17e   : > { %v801_v44 = vadd.f32 %v800_v26, %v705_v55  ;;  %1006 = vmatmul.f32.gmra.mxu0 %v3922_v10  ;;  %1093 = vmatmul.f32.gmra.mxu1 %v3940_v28 }
 0x180   : > { %v4106_v62 = vadd.f32 %v910_v5, %v801_v44  ;;  %1224 = vmatmul.f32.gmra.mxu2 %v3978_v22 }
 0x182   : > { %1331 = vmatmul.f32.gmra.mxu3 %v3940_v28 }
 0x183   : > { %v601_v1 = vpop.f32.mrf.mxu0  ;;  %v712_v54 = vpop.f32.mrf.mxu1 }
 0x184   : > { %v709_v32 = vadd.f32 %v708_v15, %v601_v1  ;;  %v805_v40 = vpop.f32.mrf.mxu2  ;;  %v1739_v15 = vld [vmem:[#allocation5 + $0x10] sm:$0xff] }
 0x185   : > { %v916_v37 = vpop.f32.mrf.mxu3  ;;  %v4118_v1 = vand.u32 4294901760, %v1739_v15 }
 0x186   : > { %v806_v9 = vadd.f32 %v805_v40, %v709_v32  ;;  %1010 = vmatmul.f32.gmra.mxu0 %v3940_v28  ;;  %1097 = vmatmul.f32.gmra.mxu1 %v3958_v53 }
 0x187   : > { %1804 = vmatpush.msrb.mxu0 %v4118_v1  ;;  %2143 = vmatpush.msrb.mxu3 %v4118_v1 }
 0x188   : > { %v4112_v11 = vadd.f32 %v916_v37, %v806_v9  ;;  %1232 = vmatmul.f32.gmra.mxu2 %v3996_v57  ;;  %v4124_v57 = vsub.f32 %v1739_v15, %v4118_v1 }
 0x18a   : > { %5015 = vst [vmem:[#allocation25_spill] sm:$0xff] %v4112_v11  ;;  %1335 = vmatmul.f32.gmra.mxu3 %v3958_v53  ;;  %2043 = vmatpush.msrb.mxu2 %v4124_v57  ;;  %v1952_v37 = vand.u32 4294901760, %v4124_v57 }
 0x18b   : > { %v609_v35 = vpop.f32.mrf.mxu0  ;;  %v716_v22 = vpop.f32.mrf.mxu1 }
 0x18c   : > { %v713_v55 = vadd.f32 %v712_v54, %v609_v35  ;;  %v810_v26 = vpop.f32.mrf.mxu2 }
 0x18d   : > { %v922_v5 = vpop.f32.mrf.mxu3 }
 0x18e   : > { %v811_v44 = vadd.f32 %v810_v26, %v713_v55  ;;  %1014 = vmatmul.f32.gmra.mxu0 %v3958_v53  ;;  %1101 = vmatmul.f32.gmra.mxu1 %v3976_v19 }
 0x190   : > { %v4120_v32 = vadd.f32 %v922_v5, %v811_v44  ;;  %1240 = vmatmul.f32.gmra.mxu2 %v4013_v0  ;;  %v1953_v0 = vsub.f32 %v4124_v57, %v1952_v37 }
 0x192   : > { %5016 = vst [vmem:[#allocation26_spill] sm:$0xff] %v4120_v32  ;;  %1339 = vmatmul.f32.gmra.mxu3 %v3976_v19  ;;  %v1954_v5 = vand.u32 4294901760, %v1953_v0 }
 0x193   : > { %v617_v54 = vpop.f32.mrf.mxu0  ;;  %v720_v40 = vpop.f32.mrf.mxu1 }
 0x194   : > { %v717_v9 = vadd.f32 %v716_v22, %v617_v54  ;;  %v815_v35 = vpop.f32.mrf.mxu2  ;;  %1955 = vmatpush.msrb.mxu1 %v1954_v5 }
 0x195   : > { %v928_v55 = vpop.f32.mrf.mxu3 }
 0x196   : > { %v816_v26 = vadd.f32 %v815_v35, %v717_v9  ;;  %1018 = vmatmul.f32.gmra.mxu0 %v3976_v19  ;;  %1105 = vmatmul.f32.gmra.mxu1 %v3994_v51 }
 0x198   : > { %v4136_v44 = vadd.f32 %v928_v55, %v816_v26  ;;  %1248 = vmatmul.f32.gmra.mxu2 %v4027_v7 }
 0x19a   : > { %1343 = vmatmul.f32.gmra.mxu3 %v3994_v51 }
 0x19b   : > { %v625_v22 = vpop.f32.mrf.mxu0  ;;  %v724_v15 = vpop.f32.mrf.mxu1 }
 0x19c   : > { %v721_v54 = vadd.f32 %v720_v40, %v625_v22  ;;  %v820_v32 = vpop.f32.mrf.mxu2 }
 0x19d   : > { %v934_v53 = vpop.f32.mrf.mxu3 }
 0x19e   : > { %v821_v11 = vadd.f32 %v820_v32, %v721_v54  ;;  %1022 = vmatmul.f32.gmra.mxu0 %v3994_v51  ;;  %1109 = vmatmul.f32.gmra.mxu1 %v4011_v33 }
 0x1a0   : > { %v4142_v9 = vadd.f32 %v934_v53, %v821_v11  ;;  %1256 = vmatmul.f32.gmra.mxu2 %v4038_v8 }
 0x1a2   : > { %1347 = vmatmul.f32.gmra.mxu3 %v4011_v33 }
 0x1a3   : > { %v633_v7 = vpop.f32.mrf.mxu0  ;;  %v1050_v35 = vpop.f32.mrf.mxu1 }
 0x1a4   : > { %v725_v55 = vadd.f32 %v724_v15, %v633_v7  ;;  %v825_v0 = vpop.f32.mrf.mxu2 }
 0x1a5   : > { %v940_v26 = vpop.f32.mrf.mxu3 }
 0x1a6   : > { %v826_v5 = vadd.f32 %v825_v0, %v725_v55  ;;  %1026 = vmatmul.f32.gmra.mxu0 %v4011_v33  ;;  %1473 = vmatmul.f32.vlgmr.msra.gmra.mxu1 %v3761_v30 }
 0x1a8   : > { %v4148_v32 = vadd.f32 %v940_v26, %v826_v5  ;;  %1590 = vmatmul.f32.vlgmr.msra.gmra.mxu2 %v3751_v25 }
 0x1aa   : > { %1673 = vmatmul.f32.vlgmr.msra.gmra.mxu3 %v3751_v25 }
 0x1ab   : > { %v967_v53 = vpop.f32.mrf.mxu0  ;;  %v1054_v8 = vpop.f32.mrf.mxu1 }
 0x1ac   : > { %v968_v11 = vadd.f32 %v967_v53, %v4046_v24  ;;  %v1137_v40 = vpop.f32.mrf.mxu2 }
 0x1ad   : > { %v1288_v22 = vpop.f32.mrf.mxu3 }
 0x1ae   : > { %v4153_v15 = vadd.f32 %v1050_v35, %v968_v11  ;;  %v4155_v54 = vadd.f32 %v1288_v22, %v1137_v40  ;;  %1373 = vmatmul.f32.vlgmr.msra.gmra.mxu0 %v3754_v27  ;;  %1479 = vmatmul.f32.gmra.mxu1 %v3786_v43 }
 0x1b0   : > { %1594 = vmatmul.f32.gmra.mxu2 %v3771_v38 }
 0x1b2   : > { %1677 = vmatmul.f32.gmra.mxu3 %v3771_v38 }
 0x1b3   : > { %v971_v30 = vpop.f32.mrf.mxu0  ;;  %v1058_v25 = vpop.f32.mrf.mxu1 }
 0x1b4   : > { %v972_v7 = vadd.f32 %v971_v30, %v4052_v23  ;;  %v1145_v55 = vpop.f32.mrf.mxu2 }
 0x1b5   : > { %v1292_v24 = vpop.f32.mrf.mxu3 }
 0x1b6   : > { %v4162_v0 = vadd.f32 %v1054_v8, %v972_v7  ;;  %v4164_v35 = vadd.f32 %v1292_v24, %v1145_v55  ;;  %1378 = vmatmul.f32.gmra.mxu0 %v3776_v41  ;;  %1485 = vmatmul.f32.gmra.mxu1 %v3798_v50 }
 0x1b8   : > { %1598 = vmatmul.f32.gmra.mxu2 %v3769_v36 }
 0x1ba   : > { %1681 = vmatmul.f32.gmra.mxu3 %v3769_v36 }
 0x1bb   : > { %v975_v27 = vpop.f32.mrf.mxu0  ;;  %v1062_v38 = vpop.f32.mrf.mxu1 }
 0x1bc   : > { %v976_v43 = vadd.f32 %v975_v27, %v4058_v20  ;;  %v1153_v26 = vpop.f32.mrf.mxu2 }
 0x1bd   : > { %v1296_v23 = vpop.f32.mrf.mxu3 }
 0x1be   : > { %v4171_v5 = vadd.f32 %v1058_v25, %v976_v43  ;;  %v4173_v53 = vadd.f32 %v1296_v23, %v1153_v26  ;;  %1383 = vmatmul.f32.gmra.mxu0 %v3782_v42  ;;  %1491 = vmatmul.f32.gmra.mxu1 %v3816_v59 }
 0x1c0   : > { %1602 = vmatmul.f32.gmra.mxu2 %v3793_v48 }
 0x1c2   : > { %1685 = vmatmul.f32.gmra.mxu3 %v3793_v48 }
 0x1c3   : > { %v979_v41 = vpop.f32.mrf.mxu0  ;;  %v1066_v36 = vpop.f32.mrf.mxu1 }
 0x1c4   : > { %v980_v50 = vadd.f32 %v979_v41, %v4064_v39  ;;  %v1161_v8 = vpop.f32.mrf.mxu2 }
 0x1c5   : > { %v1300_v20 = vpop.f32.mrf.mxu3 }
 0x1c6   : > { %v4180_v11 = vadd.f32 %v1062_v38, %v980_v50  ;;  %v4182_v40 = vadd.f32 %v1300_v20, %v1161_v8  ;;  %1388 = vmatmul.f32.gmra.mxu0 %v3803_v52  ;;  %1497 = vmatmul.f32.gmra.mxu1 %v3834_v4  ;;  %v1737_v52 = vld [vmem:[#allocation5] sm:$0xff] }
 0x1c7   : > { %v1805_v4 = vand.u32 4294901760, %v1737_v52 }
 0x1c8   : > { %1606 = vmatmul.f32.gmra.mxu2 %v3811_v56 }
 0x1c9   : > { %v1957_v7 = vsub.f32 %v1737_v52, %v1805_v4  ;;  %1806 = vmatpush.msrb.mxu0 %v1805_v4  ;;  %2145 = vmatpush.msrb.mxu3 %v1805_v4  ;;  %v5023_v52 = vld [vmem:[#allocation11_spill] sm:$0xff] }
 0x1ca   : > { %1689 = vmatmul.f32.gmra.mxu3 %v3811_v56 }
 0x1cb   : > { %v983_v42 = vpop.f32.mrf.mxu0  ;;  %v1070_v48 = vpop.f32.mrf.mxu1  ;;  %2260 = vmatpush.msra.mxu0 %v1952_v37  ;;  %2046 = vmatpush.msrb.mxu2 %v1957_v7  ;;  %v1958_v55 = vand.u32 4294901760, %v1957_v7 }
 0x1cc   : > { %v984_v59 = vadd.f32 %v983_v42, %v4070_v49  ;;  %v1169_v22 = vpop.f32.mrf.mxu2 }
 0x1cd   : > { %v1304_v39 = vpop.f32.mrf.mxu3  ;;  %v1959_v27 = vsub.f32 %v1957_v7, %v1958_v55  ;;  %2264 = vmatpush.msra.mxu0 %v1958_v55  ;;  %v5026_v55 = vld [vmem:[#allocation12_spill] sm:$0xff] }
 0x1ce   : > { %v4189_v30 = vadd.f32 %v1066_v36, %v984_v59  ;;  %v4191_v25 = vadd.f32 %v1304_v39, %v1169_v22  ;;  %1393 = vmatmul.f32.gmra.mxu0 %v3821_v61  ;;  %1503 = vmatmul.f32.gmra.mxu1 %v3852_v18 }
 0x1d0   : > { %5017 = vst [vmem:[#allocation27_spill] sm:$0xff] %v4189_v30  ;;  %1610 = vmatmul.f32.gmra.mxu2 %v3829_v2 }
 0x1d2   : > { %1693 = vmatmul.f32.gmra.mxu3 %v3829_v2  ;;  %v1960_v2 = vand.u32 4294901760, %v1959_v27 }
 0x1d3   : > { %v987_v56 = vpop.f32.mrf.mxu0  ;;  %v1074_v49 = vpop.f32.mrf.mxu1 }
 0x1d4   : > { %v988_v61 = vadd.f32 %v987_v56, %v4076_v58  ;;  %v1177_v24 = vpop.f32.mrf.mxu2  ;;  %1961 = vmatpush.msrb.mxu1 %v1960_v2 }
 0x1d5   : > { %v1308_v18 = vpop.f32.mrf.mxu3 }
 0x1d6   : > { %v4200_v38 = vadd.f32 %v1070_v48, %v988_v61  ;;  %v4202_v43 = vadd.f32 %v1308_v18, %v1177_v24  ;;  %1398 = vmatmul.f32.gmra.mxu0 %v3839_v6  ;;  %1509 = vmatmul.f32.gmra.mxu1 %v3872_v31  ;;  %v5027_v61 = vld [vmem:[#allocation16_spill] sm:$0xff]  ;;  %v5028_v18 = vld [vmem:[#allocation25_spill] sm:$0xff] }
 0x1d7   : > { %2345 = vmatpush.msra.mxu1 %v4118_v1 }
 0x1d8   : > { %5018 = vst [vmem:[#allocation28_spill] sm:$0xff] %v4200_v38  ;;  %1614 = vmatmul.f32.gmra.mxu2 %v3847_v13 }
 0x1d9   : > { %2347 = vmatpush.msra.mxu1 %v1805_v4  ;;  %v5024_v4 = vld [vmem:[#allocation13_spill] sm:$0xff] }
 0x1da   : > { %1697 = vmatmul.f32.gmra.mxu3 %v3847_v13 }
 0x1db   : > { %v991_v58 = vpop.f32.mrf.mxu0  ;;  %v1078_v57 = vpop.f32.mrf.mxu1 }
 0x1dc   : > { %v992_v37 = vadd.f32 %v991_v58, %v4082_v3  ;;  %v1185_v26 = vpop.f32.mrf.mxu2 }
 0x1dd   : > { %v1312_v23 = vpop.f32.mrf.mxu3 }
 0x1de   : > { %v4210_v41 = vadd.f32 %v1074_v49, %v992_v37  ;;  %v4212_v6 = vadd.f32 %v1312_v23, %v1185_v26  ;;  %1403 = vmatmul.f32.gmra.mxu0 %v3859_v21  ;;  %1515 = vmatmul.f32.gmra.mxu1 %v3891_v47  ;;  %v5030_v37 = vld [vmem:[#allocation14_spill] sm:$0xff]  ;;  %v5032_v23 = vld [vmem:[#allocation15_spill] sm:$0xff] }
 0x1df   : > { %v5031_v26 = vld [vmem:[#allocation18_spill] sm:$0xff] }
 0x1e0   : > { %5019 = vst [vmem:[#allocation29_spill] sm:$0xff] %v4210_v41  ;;  %1618 = vmatmul.f32.gmra.mxu2 %v3867_v16 }
 0x1e2   : > { %1701 = vmatmul.f32.gmra.mxu3 %v3867_v16 }
 0x1e3   : > { %v995_v13 = vpop.f32.mrf.mxu0  ;;  %v1082_v31 = vpop.f32.mrf.mxu1 }
 0x1e4   : > { %v996_v1 = vadd.f32 %v995_v13, %v4088_v17  ;;  %v1193_v3 = vpop.f32.mrf.mxu2 }
 0x1e5   : > { %v1316_v36 = vpop.f32.mrf.mxu3 }
 0x1e6   : > { %v4219_v50 = vadd.f32 %v1078_v57, %v996_v1  ;;  %v4221_v8 = vadd.f32 %v1316_v36, %v1193_v3  ;;  %1408 = vmatmul.f32.gmra.mxu0 %v3877_v34  ;;  %1521 = vmatmul.f32.gmra.mxu1 %v3909_v63 }
 0x1e8   : > { %5020 = vst [vmem:[#allocation30_spill] sm:$0xff] %v4219_v50  ;;  %1622 = vmatmul.f32.gmra.mxu2 %v3886_v45 }
 0x1ea   : > { %1705 = vmatmul.f32.gmra.mxu3 %v3886_v45 }
 0x1eb   : > { %v999_v21 = vpop.f32.mrf.mxu0  ;;  %v1086_v16 = vpop.f32.mrf.mxu1 }
 0x1ec   : > { %v1000_v47 = vadd.f32 %v999_v21, %v4094_v29  ;;  %v1201_v20 = vpop.f32.mrf.mxu2 }
 0x1ed   : > { %v1320_v17 = vpop.f32.mrf.mxu3 }
 0x1ee   : > { %v4228_v42 = vadd.f32 %v1082_v31, %v1000_v47  ;;  %v4230_v48 = vadd.f32 %v1320_v17, %v1201_v20  ;;  %1413 = vmatmul.f32.gmra.mxu0 %v3896_v14  ;;  %1527 = vmatmul.f32.gmra.mxu1 %v3927_v12  ;;  %v5033_v31 = vld [vmem:[#allocation26_spill] sm:$0xff]  ;;  %v5035_v47 = vld [vmem:[#allocation17_spill] sm:$0xff]  ;;  %v5036_v20 = vld [vmem:[#allocation20_spill] sm:$0xff] }
 0x1ef   : > { %v1740_v17 = vld [vmem:[#allocation5 + $0x18] sm:$0xff] }
 0x1f0   : > { %5021 = vst [vmem:[#allocation31_spill] sm:$0xff] %v4228_v42  ;;  %1626 = vmatmul.f32.gmra.mxu2 %v3904_v60 }
 0x1f2   : > { %1709 = vmatmul.f32.gmra.mxu3 %v3904_v60 }
 0x1f3   : > { %v1003_v34 = vpop.f32.mrf.mxu0  ;;  %v1090_v45 = vpop.f32.mrf.mxu1 }
 0x1f4   : > { %v1004_v63 = vadd.f32 %v1003_v34, %v4100_v46  ;;  %v1209_v59 = vpop.f32.mrf.mxu2  ;;  %v4271_v34 = vand.u32 4294901760, %v1740_v17 }
 0x1f5   : > { %v1324_v29 = vpop.f32.mrf.mxu3 }
 0x1f6   : > { %v4237_v22 = vadd.f32 %v1086_v16, %v1004_v63  ;;  %v4239_v39 = vadd.f32 %v1324_v29, %v1209_v59  ;;  %1418 = vmatmul.f32.gmra.mxu0 %v5023_v52  ;;  %1533 = vmatmul.f32.gmra.mxu1 %v5024_v4  ;;  %v4276_v59 = vsub.f32 %v1740_v17, %v4271_v34 }
 0x1f7   : > { %2428 = vmatpush.msra.mxu2 %v4271_v34 }
 0x1f8   : > { %5022 = vst [vmem:[#allocation32_spill] sm:$0xff] %v4237_v22  ;;  %1630 = vmatmul.f32.gmra.mxu2 %v3922_v10  ;;  %v5054_v22 = vand.u32 4294901760, %v4276_v59 }
 0x1fa   : > { %1713 = vmatmul.f32.gmra.mxu3 %v3922_v10 }
 0x1fb   : > { %v1007_v14 = vpop.f32.mrf.mxu0  ;;  %v1094_v60 = vpop.f32.mrf.mxu1 }
 0x1fc   : > { %v1008_v12 = vadd.f32 %v1007_v14, %v4106_v62  ;;  %v1217_v7 = vpop.f32.mrf.mxu2  ;;  %v4978_v14 = vand.u32 4294901760, %v4276_v59 }
 0x1fd   : > { %v1328_v46 = vpop.f32.mrf.mxu3 }
 0x1fe   : > { %v4246_v56 = vadd.f32 %v1090_v45, %v1008_v12  ;;  %v4248_v49 = vadd.f32 %v1328_v46, %v1217_v7  ;;  %1423 = vmatmul.f32.gmra.mxu0 %v5026_v55  ;;  %1539 = vmatmul.f32.gmra.mxu1 %v5027_v61  ;;  %v5039_v55 = vld [vmem:[#allocation22_spill] sm:$0xff]  ;;  %v2577_v61 = vsub.f32 %v4276_v59, %v4978_v14 }
 0x200   : > { %5025 = vst [vmem:[#allocation11_spill] sm:$0xff] %v4246_v56  ;;  %1634 = vmatmul.f32.gmra.mxu2 %v3940_v28 }
 0x202   : > { %1717 = vmatmul.f32.gmra.mxu3 %v3940_v28 }
 0x203   : > { %v1011_v24 = vpop.f32.mrf.mxu0  ;;  %v1098_v10 = vpop.f32.mrf.mxu1 }
 0x204   : > { %v1012_v27 = vadd.f32 %v1011_v24, %v5028_v18  ;;  %v1225_v2 = vpop.f32.mrf.mxu2  ;;  %v2578_v24 = vand.u32 4294901760, %v2577_v61 }
 0x205   : > { %v1332_v62 = vpop.f32.mrf.mxu3 }
 0x206   : > { %v4255_v58 = vadd.f32 %v1094_v60, %v1012_v27  ;;  %v4257_v57 = vadd.f32 %v1332_v62, %v1225_v2  ;;  %1428 = vmatmul.f32.gmra.mxu0 %v5030_v37  ;;  %1545 = vmatmul.f32.gmra.mxu1 %v5031_v26  ;;  %v3453_v60 = vld [vmem:[%s3746_s30] sm:$0xff] }
 0x207   : > { %v1742_v12 = vsel %vm440_vm0, %v3453_v60, 0  ;;  %2579 = vmatpush.msra.mxu3 %v2578_v24 }
 0x208   : > { %5029 = vst [vmem:[#allocation13_spill] sm:$0xff] %v4255_v58  ;;  %1638 = vmatmul.f32.gmra.mxu2 %v5032_v23 }
 0x20a   : > { %1721 = vmatmul.f32.gmra.mxu3 %v5032_v23 }
 0x20b   : > { %v1015_v13 = vpop.f32.mrf.mxu0  ;;  %v1102_v28 = vpop.f32.mrf.mxu1 }
 0x20c   : > { %v1016_v1 = vadd.f32 %v1015_v13, %v5033_v31  ;;  %v1233_v3 = vpop.f32.mrf.mxu2  ;;  %v5041_v13 = vld [vmem:[#allocation21_spill] sm:$0xff]  ;;  %v3454_v31 = vld [vmem:[%s3746_s30 + $0x8] sm:$0xff] }
 0x20d   : > { %v1336_v36 = vpop.f32.mrf.mxu3 }
 0x20e   : > { %v4264_v21 = vadd.f32 %v1098_v10, %v1016_v1  ;;  %v4266_v16 = vadd.f32 %v1336_v36, %v1233_v3  ;;  %1433 = vmatmul.f32.gmra.mxu0 %v5035_v47  ;;  %1551 = vmatmul.f32.gmra.mxu1 %v5036_v20 }
 0x210   : > { %5034 = vst [vmem:[#allocation12_spill] sm:$0xff] %v4264_v21  ;;  %1642 = vmatmul.f32.gmra.mxu2 %v3976_v19 }
 0x212   : > { %1725 = vmatmul.f32.gmra.mxu3 %v3976_v19  ;;  %v5038_v19 = vld [vmem:[#allocation19_spill] sm:$0xff] }
 0x213   : > { %v1019_v45 = vpop.f32.mrf.mxu0  ;;  %v1106_v63 = vpop.f32.mrf.mxu1 }
 0x214   : > { %v1020_v29 = vadd.f32 %v1019_v45, %v4136_v44  ;;  %v1241_v52 = vpop.f32.mrf.mxu2  ;;  %v4292_v44 = vand.u32 4294901760, %v1742_v12 }
 0x215   : > { %v1340_v4 = vpop.f32.mrf.mxu3 }
 0x216   : > { %v4282_v7 = vadd.f32 %v1102_v28, %v1020_v29  ;;  %v4284_v46 = vadd.f32 %v1340_v4, %v1241_v52  ;;  %1438 = vmatmul.f32.gmra.mxu0 %v5038_v19  ;;  %1557 = vmatmul.f32.gmra.mxu1 %v5039_v55  ;;  %v4297_v62 = vsub.f32 %v1742_v12, %v4292_v44  ;;  %v5042_v28 = vld [vmem:[#allocation24_spill] sm:$0xff]  ;;  %v5044_v4 = vld [vmem:[#allocation23_spill] sm:$0xff] }
 0x218   : > { %5037 = vst [vmem:[#allocation16_spill] sm:$0xff] %v4282_v7  ;;  %1646 = vmatmul.f32.gmra.mxu2 %v3994_v51 }
 0x21a   : > { %1729 = vmatmul.f32.gmra.mxu3 %v3994_v51  ;;  %v1745_v51 = vsel %vm440_vm0, %v3454_v31, 0 }
 0x21b   : > { %v1023_v10 = vpop.f32.mrf.mxu0  ;;  %v1110_v18 = vpop.f32.mrf.mxu1  ;;  %v4311_v1 = vand.u32 4294901760, %v1745_v51 }
 0x21c   : > { %v1024_v27 = vadd.f32 %v1023_v10, %v4142_v9  ;;  %v1249_v2 = vpop.f32.mrf.mxu2  ;;  %v4309_v9 = vand.u32 4294901760, %v4297_v62 }
 0x21d   : > { %v1344_v37 = vpop.f32.mrf.mxu3 }
 0x21e   : > { %v4299_v26 = vadd.f32 %v1106_v63, %v1024_v27  ;;  %v4301_v23 = vadd.f32 %v1344_v37, %v1249_v2  ;;  %1443 = vmatmul.f32.gmra.mxu0 %v5041_v13  ;;  %1563 = vmatmul.f32.gmra.mxu1 %v5042_v28  ;;  %v1810_v17 = vsub.f32 %v4297_v62, %v4309_v9  ;;  %v3456_v13 = vld [vmem:[%s3746_s30 + $0x18] sm:$0xff] }
 0x21f   : > { %v4318_v63 = vsub.f32 %v1745_v51, %v4311_v1  ;;  %v1751_v28 = vsel %vm440_vm0, %v3456_v13, 0 }
 0x220   : > { %5040 = vst [vmem:[#allocation25_spill] sm:$0xff] %v4299_v26  ;;  %1650 = vmatmul.f32.gmra.mxu2 %v4011_v33  ;;  %v4333_v12 = vand.u32 4294901760, %v1810_v17 }
 0x221   : > { %v4336_v19 = vand.u32 4294901760, %v4318_v63 }
 0x222   : > { %1733 = vmatmul.f32.gmra.mxu3 %v4011_v33  ;;  %v3455_v33 = vld [vmem:[%s3746_s30 + $0x10] sm:$0xff] }
 0x223   : > { %v1027_v3 = vpop.f32.mrf.mxu0  ;;  %v1474_v36 = vpop.f32.mrf.mxu1  ;;  %v1748_v60 = vsel %vm440_vm0, %v3455_v33, 0  ;;  %v1818_v37 = vsub.f32 %v4318_v63, %v4336_v19 }
 0x224   : > { %v1028_v47 = vadd.f32 %v1027_v3, %v4148_v32  ;;  %v1257_v20 = vpop.f32.mrf.mxu2  ;;  %v4330_v32 = vand.u32 4294901760, %v1748_v60 }
 0x225   : > { %v1348_v45 = vpop.f32.mrf.mxu3  ;;  %v4355_v3 = vand.u32 4294901760, %v1818_v37 }
 0x226   : > { %v4320_v29 = vadd.f32 %v1110_v18, %v1028_v47  ;;  %v4322_v52 = vadd.f32 %v1348_v45, %v1257_v20  ;;  %1448 = vmatmul.f32.gmra.mxu0 %v5044_v4  ;;  %1963 = vmatmul.f32.vlgmr.msrb.gmra.mxu1 %v4292_v44  ;;  %v4340_v27 = vsub.f32 %v1748_v60, %v4330_v32 }
 0x227   : > { %2767 = vmatpush.msrb.mxu1 %v4271_v34 }
 0x228   : > { %5043 = vst [vmem:[#allocation14_spill] sm:$0xff] %v4320_v29  ;;  %2049 = vmatmul.f32.vlgmr.msrb.gmra.mxu2 %v4297_v62 }
 0x22a   : > { %2149 = vmatmul.f32.vlgmr.msrb.gmra.mxu3 %v4309_v9 }
 0x22b   : > { %v1374_v55 = vpop.f32.mrf.mxu0  ;;  %v1480_v61 = vpop.f32.mrf.mxu1 }
 0x22c   : > { %v1375_v24 = vadd.f32 %v1374_v55, %v4155_v54  ;;  %v1591_v10 = vpop.f32.mrf.mxu2  ;;  %v4350_v54 = vand.u32 4294901760, %v1751_v28 }
 0x22d   : > { %v1674_v18 = vpop.f32.mrf.mxu3 }
 0x22e   : > { %v1475_v2 = vadd.f32 %v1474_v36, %v1375_v24  ;;  %1812 = vmatmul.f32.vlgmr.msrb.gmra.mxu0 %v4333_v12  ;;  %1967 = vmatmul.f32.gmra.mxu1 %v4311_v1  ;;  %v4358_v36 = vand.u32 4294901760, %v4340_v27  ;;  %v4362_v33 = vsub.f32 %v1751_v28, %v4350_v54  ;;  %v3457_v24 = vld [vmem:[%s3746_s30 + $0x20] sm:$0xff] }
 0x22f   : > { %2667 = vmatpush.msrb.mxu0 %v4276_v59 }
 0x230   : > { %v1592_v31 = vadd.f32 %v1591_v10, %v1475_v2  ;;  %2054 = vmatmul.f32.gmra.mxu2 %v4318_v63  ;;  %v1826_v55 = vsub.f32 %v4340_v27, %v4358_v36  ;;  %v1754_v10 = vsel %vm440_vm0, %v3457_v24, 0  ;;  %v4379_v37 = vand.u32 4294901760, %v4362_v33 }
 0x232   : > { %v4352_v51 = vadd.f32 %v1674_v18, %v1592_v31  ;;  %2155 = vmatmul.f32.gmra.mxu3 %v4336_v19 }
 0x233   : > { %v1379_v47 = vpop.f32.mrf.mxu0  ;;  %v1486_v20 = vpop.f32.mrf.mxu1 }
 0x234   : > { %5045 = vst [vmem:[#allocation18_spill] sm:$0xff] %v4352_v51  ;;  %v1380_v17 = vadd.f32 %v1379_v47, %v4164_v35  ;;  %v1595_v45 = vpop.f32.mrf.mxu2  ;;  %v4371_v35 = vand.u32 4294901760, %v1754_v10 }
 0x235   : > { %v1678_v4 = vpop.f32.mrf.mxu3 }
 0x236   : > { %v1481_v60 = vadd.f32 %v1480_v61, %v1380_v17  ;;  %1820 = vmatmul.f32.gmra.mxu0 %v4355_v3  ;;  %1971 = vmatmul.f32.gmra.mxu1 %v4330_v32  ;;  %v4376_v61 = vand.u32 4294901760, %v1826_v55  ;;  %v3458_v55 = vld [vmem:[%s3746_s30 + $0x28] sm:$0xff] }
 0x237   : > { %v1757_v24 = vsel %vm440_vm0, %v3458_v55, 0 }
 0x238   : > { %v1596_v18 = vadd.f32 %v1595_v45, %v1481_v60  ;;  %2059 = vmatmul.f32.gmra.mxu2 %v4340_v27  ;;  %v4383_v45 = vsub.f32 %v1754_v10, %v4371_v35 }
 0x23a   : > { %v4373_v2 = vadd.f32 %v1678_v4, %v1596_v18  ;;  %2161 = vmatmul.f32.gmra.mxu3 %v4358_v36  ;;  %v1834_v4 = vsub.f32 %v4362_v33, %v4379_v37  ;;  %v4400_v10 = vand.u32 4294901760, %v4383_v45 }
 0x23b   : > { %v1384_v13 = vpop.f32.mrf.mxu0  ;;  %v1492_v28 = vpop.f32.mrf.mxu1 }
 0x23c   : > { %5046 = vst [vmem:[#allocation15_spill] sm:$0xff] %v4373_v2  ;;  %v1385_v31 = vadd.f32 %v1384_v13, %v4173_v53  ;;  %v1599_v47 = vpop.f32.mrf.mxu2  ;;  %v4392_v53 = vand.u32 4294901760, %v1757_v24 }
 0x23d   : > { %v1682_v17 = vpop.f32.mrf.mxu3 }
 0x23e   : > { %v1487_v60 = vadd.f32 %v1486_v20, %v1385_v31  ;;  %1828 = vmatmul.f32.gmra.mxu0 %v4376_v61  ;;  %1975 = vmatmul.f32.gmra.mxu1 %v4350_v54  ;;  %v4397_v20 = vand.u32 4294901760, %v1834_v4  ;;  %v3459_v4 = vld [vmem:[%s3746_s30 + $0x30] sm:$0xff] }
 0x240   : > { %v1600_v18 = vadd.f32 %v1599_v47, %v1487_v60  ;;  %2064 = vmatmul.f32.gmra.mxu2 %v4362_v33  ;;  %v4404_v60 = vsub.f32 %v1757_v24, %v4392_v53 }
 0x242   : > { %v4394_v13 = vadd.f32 %v1682_v17, %v1600_v18  ;;  %2167 = vmatmul.f32.gmra.mxu3 %v4379_v37  ;;  %5048 = vst [vmem:[#allocation17_spill] sm:$0xff] %v4404_v60  ;;  %v1842_v17 = vsub.f32 %v4383_v45, %v4400_v10  ;;  %v1760_v18 = vsel %vm440_vm0, %v3459_v4, 0 }
 0x243   : > { %v1389_v31 = vpop.f32.mrf.mxu0  ;;  %v1498_v14 = vpop.f32.mrf.mxu1 }
 0x244   : > { %5047 = vst [vmem:[#allocation26_spill] sm:$0xff] %v4394_v13  ;;  %v1390_v2 = vadd.f32 %v1389_v31, %v4182_v40  ;;  %v1603_v55 = vpop.f32.mrf.mxu2  ;;  %v4413_v40 = vand.u32 4294901760, %v1760_v18 }
 0x245   : > { %v1686_v47 = vpop.f32.mrf.mxu3 }
 0x246   : > { %v1493_v51 = vadd.f32 %v1492_v28, %v1390_v2  ;;  %1836 = vmatmul.f32.gmra.mxu0 %v4397_v20  ;;  %1979 = vmatmul.f32.gmra.mxu1 %v4371_v35  ;;  %v4418_v2 = vand.u32 4294901760, %v1842_v17  ;;  %v4421_v28 = vand.u32 4294901760, %v4404_v60 }
 0x248   : > { %v1604_v13 = vadd.f32 %v1603_v55, %v1493_v51  ;;  %2069 = vmatmul.f32.gmra.mxu2 %v4383_v45  ;;  %5050 = vst [vmem:[#allocation19_spill] sm:$0xff] %v4421_v28  ;;  %v4425_v55 = vsub.f32 %v1760_v18, %v4413_v40 }
 0x24a   : > { %v4415_v31 = vadd.f32 %v1686_v47, %v1604_v13  ;;  %2173 = vmatmul.f32.gmra.mxu3 %v4400_v10  ;;  %5051 = vst [vmem:[#allocation22_spill] sm:$0xff] %v4425_v55  ;;  %v1850_v13 = vsub.f32 %v4404_v60, %v4421_v28  ;;  %v3460_v47 = vld [vmem:[%s3746_s30 + $0x38] sm:$0xff] }
 0x24b   : > { %v1394_v24 = vpop.f32.mrf.mxu0  ;;  %v1504_v29 = vpop.f32.mrf.mxu1  ;;  %v1763_v17 = vsel %vm440_vm0, %v3460_v47, 0 }
 0x24c   : > { %5049 = vst [vmem:[#allocation20_spill] sm:$0xff] %v4415_v31  ;;  %v1395_v26 = vadd.f32 %v1394_v24, %v4191_v25  ;;  %v1607_v4 = vpop.f32.mrf.mxu2  ;;  %v1738_v25 = vld [vmem:[#allocation5 + $0x8] sm:$0xff]  ;;  %v4434_v21 = vand.u32 4294901760, %v1763_v17 }
 0x24d   : > { %v1690_v51 = vpop.f32.mrf.mxu3  ;;  %v2429_v24 = vand.u32 4294901760, %v1738_v25 }
 0x24e   : > { %v1499_v7 = vadd.f32 %v1498_v14, %v1395_v26  ;;  %1844 = vmatmul.f32.gmra.mxu0 %v4418_v2  ;;  %1983 = vmatmul.f32.gmra.mxu1 %v4392_v53  ;;  %v4439_v14 = vand.u32 4294901760, %v1850_v13  ;;  %v4442_v26 = vand.u32 4294901760, %v4425_v55  ;;  %v4448_v13 = vsub.f32 %v1763_v17, %v4434_v21 }
 0x24f   : > { %2430 = vmatpush.msra.mxu2 %v2429_v24  ;;  %2769 = vmatpush.msrb.mxu1 %v2429_v24 }
 0x250   : > { %v1608_v31 = vadd.f32 %v1607_v4, %v1499_v7  ;;  %2074 = vmatmul.f32.gmra.mxu2 %v4404_v60  ;;  %5053 = vst [vmem:[#allocation24_spill] sm:$0xff] %v4442_v26  ;;  %v2581_v7 = vsub.f32 %v1738_v25, %v2429_v24  ;;  %v1858_v42 = vsub.f32 %v4425_v55, %v4442_v26  ;;  %v3461_v25 = vld [vmem:[%s3746_s30 + $0x40] sm:$0xff] }
 0x251   : > { %2884 = vmatpush.msrb.mxu2 %v5054_v22  ;;  %5055 = vst [vmem:[#allocation23_spill] sm:$0xff] %v4448_v13 }
 0x252   : > { %v4436_v18 = vadd.f32 %v1690_v51, %v1608_v31  ;;  %2179 = vmatmul.f32.gmra.mxu3 %v4421_v28  ;;  %v2582_v51 = vand.u32 4294901760, %v2581_v7  ;;  %2670 = vmatpush.msrb.mxu0 %v2581_v7 }
 0x253   : > { %v1399_v58 = vpop.f32.mrf.mxu0  ;;  %v1510_v56 = vpop.f32.mrf.mxu1 }
 0x254   : > { %5052 = vst [vmem:[#allocation21_spill] sm:$0xff] %v4436_v18  ;;  %v1400_v4 = vadd.f32 %v1399_v58, %v4202_v43  ;;  %v1611_v47 = vpop.f32.mrf.mxu2  ;;  %v1766_v43 = vsel %vm440_vm0, %v3461_v25, 0  ;;  %v2583_v58 = vsub.f32 %v2581_v7, %v2582_v51  ;;  %2888 = vmatpush.msrb.mxu2 %v2582_v51 }
 0x255   : > { %v1694_v31 = vpop.f32.mrf.mxu3  ;;  %v4457_v50 = vand.u32 4294901760, %v1766_v43 }
 0x256   : > { %v1505_v18 = vadd.f32 %v1504_v29, %v1400_v4  ;;  %1852 = vmatmul.f32.gmra.mxu0 %v4439_v14  ;;  %1987 = vmatmul.f32.gmra.mxu1 %v4413_v40  ;;  %v2584_v59 = vand.u32 4294901760, %v2583_v58  ;;  %v4462_v29 = vand.u32 4294901760, %v1858_v42  ;;  %v4465_v4 = vand.u32 4294901760, %v4448_v13  ;;  %v3462_v58 = vld [vmem:[%s3746_s30 + $0x48] sm:$0xff] }
 0x258   : > { %v1612_v22 = vadd.f32 %v1611_v47, %v1505_v18  ;;  %2079 = vmatmul.f32.gmra.mxu2 %v4425_v55  ;;  %5057 = vst [vmem:[#allocation34_spill] sm:$0xff] %v4465_v4  ;;  %2585 = vmatpush.msra.mxu3 %v2584_v59  ;;  %v1866_v42 = vsub.f32 %v4448_v13, %v4465_v4 }
 0x25a   : > { %v4459_v17 = vadd.f32 %v1694_v31, %v1612_v22  ;;  %2185 = vmatmul.f32.gmra.mxu3 %v4442_v26  ;;  %v4470_v31 = vsub.f32 %v1766_v43, %v4457_v50  ;;  %v1769_v22 = vsel %vm440_vm0, %v3462_v58, 0 }
 0x25b   : > { %v1404_v41 = vpop.f32.mrf.mxu0  ;;  %v1516_v25 = vpop.f32.mrf.mxu1  ;;  %2969 = vmatpush.msrb.mxu3 %v4271_v34 }
 0x25c   : > { %5056 = vst [vmem:[#allocation33_spill] sm:$0xff] %v4459_v17  ;;  %v1405_v18 = vadd.f32 %v1404_v41, %v4212_v6  ;;  %v1615_v7 = vpop.f32.mrf.mxu2  ;;  %v4479_v6 = vand.u32 4294901760, %v1769_v22  ;;  %v4487_v43 = vand.u32 4294901760, %v4470_v31 }
 0x25d   : > { %v1698_v47 = vpop.f32.mrf.mxu3  ;;  %5058 = vst [vmem:[#allocation35_spill] sm:$0xff] %v4470_v31  ;;  %2971 = vmatpush.msrb.mxu3 %v2429_v24 }
 0x25e   : > { %v1511_v51 = vadd.f32 %v1510_v56, %v1405_v18  ;;  %1860 = vmatmul.f32.gmra.mxu0 %v4462_v29  ;;  %1991 = vmatmul.f32.gmra.mxu1 %v4434_v21  ;;  %v4484_v56 = vand.u32 4294901760, %v1866_v42  ;;  %5060 = vst [vmem:[#allocation37_spill] sm:$0xff] %v4487_v43  ;;  %v3463_v42 = vld [vmem:[%s3746_s30 + $0x50] sm:$0xff] }
 0x260   : > { %v1616_v41 = vadd.f32 %v1615_v7, %v1511_v51  ;;  %2084 = vmatmul.f32.gmra.mxu2 %v4448_v13  ;;  %v4491_v51 = vsub.f32 %v1769_v22, %v4479_v6 }
 0x262   : > { %v4481_v34 = vadd.f32 %v1698_v47, %v1616_v41  ;;  %2191 = vmatmul.f32.gmra.mxu3 %v4465_v4  ;;  %5061 = vst [vmem:[#allocation38_spill] sm:$0xff] %v4491_v51  ;;  %v1874_v47 = vsub.f32 %v4470_v31, %v4487_v43  ;;  %v1772_v41 = vsel %vm440_vm0, %v3463_v42, 0  ;;  %v4508_v22 = vand.u32 4294901760, %v4491_v51 }
 0x263   : > { %v1409_v59 = vpop.f32.mrf.mxu0  ;;  %v1522_v18 = vpop.f32.mrf.mxu1 }
 0x264   : > { %5059 = vst [vmem:[#allocation36_spill] sm:$0xff] %v4481_v34  ;;  %v1410_v58 = vadd.f32 %v1409_v59, %v4221_v8  ;;  %v1619_v24 = vpop.f32.mrf.mxu2  ;;  %v4500_v8 = vand.u32 4294901760, %v1772_v41 }
 0x265   : > { %v1702_v7 = vpop.f32.mrf.mxu3  ;;  %5063 = vst [vmem:[#allocation40_spill] sm:$0xff] %v4508_v22 }
 0x266   : > { %v1517_v17 = vadd.f32 %v1516_v25, %v1410_v58  ;;  %1868 = vmatmul.f32.gmra.mxu0 %v4484_v56  ;;  %1995 = vmatmul.f32.gmra.mxu1 %v4457_v50  ;;  %v4505_v25 = vand.u32 4294901760, %v1874_v47 }
 0x268   : > { %v1620_v34 = vadd.f32 %v1619_v24, %v1517_v17  ;;  %2089 = vmatmul.f32.gmra.mxu2 %v4470_v31  ;;  %v4512_v24 = vsub.f32 %v1772_v41, %v4500_v8 }
 0x26a   : > { %v4502_v59 = vadd.f32 %v1702_v7, %v1620_v34  ;;  %2197 = vmatmul.f32.gmra.mxu3 %v4487_v43  ;;  %5064 = vst [vmem:[#allocation41_spill] sm:$0xff] %v4512_v24  ;;  %v1882_v34 = vsub.f32 %v4491_v51, %v4508_v22  ;;  %v3464_v7 = vld [vmem:[%s3746_s30 + $0x58] sm:$0xff] }
 0x26b   : > { %v1414_v58 = vpop.f32.mrf.mxu0  ;;  %v1528_v13 = vpop.f32.mrf.mxu1  ;;  %v1775_v47 = vsel %vm440_vm0, %v3464_v7, 0 }
 0x26c   : > { %5062 = vst [vmem:[#allocation39_spill] sm:$0xff] %v4502_v59  ;;  %v1415_v4 = vadd.f32 %v1414_v58, %v4230_v48  ;;  %v1623_v42 = vpop.f32.mrf.mxu2  ;;  %v4521_v48 = vand.u32 4294901760, %v1775_v47 }
 0x26d   : > { %v1706_v17 = vpop.f32.mrf.mxu3 }
 0x26e   : > { %v1523_v31 = vadd.f32 %v1522_v18, %v1415_v4  ;;  %1876 = vmatmul.f32.gmra.mxu0 %v4505_v25  ;;  %1999 = vmatmul.f32.gmra.mxu1 %v4479_v6  ;;  %v4526_v4 = vand.u32 4294901760, %v1882_v34  ;;  %v4529_v18 = vand.u32 4294901760, %v4512_v24 }
 0x270   : > { %v1624_v59 = vadd.f32 %v1623_v42, %v1523_v31  ;;  %2094 = vmatmul.f32.gmra.mxu2 %v4491_v51  ;;  %5066 = vst [vmem:[#allocation43_spill] sm:$0xff] %v4529_v18  ;;  %v4533_v42 = vsub.f32 %v1775_v47, %v4521_v48 }
 0x272   : > { %v4523_v58 = vadd.f32 %v1706_v17, %v1624_v59  ;;  %2203 = vmatmul.f32.gmra.mxu3 %v4508_v22  ;;  %5067 = vst [vmem:[#allocation44_spill] sm:$0xff] %v4533_v42  ;;  %v1890_v59 = vsub.f32 %v4512_v24, %v4529_v18  ;;  %v3465_v17 = vld [vmem:[%s3746_s30 + $0x60] sm:$0xff] }
 0x273   : > { %v1419_v41 = vpop.f32.mrf.mxu0  ;;  %v1534_v43 = vpop.f32.mrf.mxu1  ;;  %v1778_v34 = vsel %vm440_vm0, %v3465_v17, 0 }
 0x274   : > { %5065 = vst [vmem:[#allocation42_spill] sm:$0xff] %v4523_v58  ;;  %v1420_v55 = vadd.f32 %v1419_v41, %v4239_v39  ;;  %v1627_v7 = vpop.f32.mrf.mxu2  ;;  %v4542_v39 = vand.u32 4294901760, %v1778_v34 }
 0x275   : > { %v1710_v31 = vpop.f32.mrf.mxu3 }
 0x276   : > { %v1529_v51 = vadd.f32 %v1528_v13, %v1420_v55  ;;  %1884 = vmatmul.f32.gmra.mxu0 %v4526_v4  ;;  %2003 = vmatmul.f32.gmra.mxu1 %v4500_v8  ;;  %v4547_v55 = vand.u32 4294901760, %v1890_v59  ;;  %v4550_v13 = vand.u32 4294901760, %v4533_v42 }
 0x278   : > { %v1628_v58 = vadd.f32 %v1627_v7, %v1529_v51  ;;  %2099 = vmatmul.f32.gmra.mxu2 %v4512_v24  ;;  %5069 = vst [vmem:[#allocation46_spill] sm:$0xff] %v4550_v13  ;;  %v4554_v7 = vsub.f32 %v1778_v34, %v4542_v39 }
 0x27a   : > { %v4544_v41 = vadd.f32 %v1710_v31, %v1628_v58  ;;  %2209 = vmatmul.f32.gmra.mxu3 %v4529_v18  ;;  %5070 = vst [vmem:[#allocation47_spill] sm:$0xff] %v4554_v7  ;;  %v1898_v58 = vsub.f32 %v4533_v42, %v4550_v13  ;;  %v3466_v31 = vld [vmem:[%s3746_s30 + $0x68] sm:$0xff] }
 0x27b   : > { %v1424_v47 = vpop.f32.mrf.mxu0  ;;  %v1540_v22 = vpop.f32.mrf.mxu1  ;;  %v1781_v59 = vsel %vm440_vm0, %v3466_v31, 0 }
 0x27c   : > { %5068 = vst [vmem:[#allocation45_spill] sm:$0xff] %v4544_v41  ;;  %v1425_v38 = vadd.f32 %v1424_v47, %v4248_v49  ;;  %v1631_v17 = vpop.f32.mrf.mxu2  ;;  %v4563_v49 = vand.u32 4294901760, %v1781_v59 }
 0x27d   : > { %v1714_v51 = vpop.f32.mrf.mxu3 }
 0x27e   : > { %v1535_v24 = vadd.f32 %v1534_v43, %v1425_v38  ;;  %1892 = vmatmul.f32.gmra.mxu0 %v4547_v55  ;;  %2007 = vmatmul.f32.gmra.mxu1 %v4521_v48  ;;  %v4568_v38 = vand.u32 4294901760, %v1898_v58  ;;  %v4571_v43 = vand.u32 4294901760, %v4554_v7 }
 0x280   : > { %v1632_v41 = vadd.f32 %v1631_v17, %v1535_v24  ;;  %2104 = vmatmul.f32.gmra.mxu2 %v4533_v42  ;;  %5072 = vst [vmem:[#allocation49_spill] sm:$0xff] %v4571_v43  ;;  %v4575_v17 = vsub.f32 %v1781_v59, %v4563_v49 }
 0x282   : > { %v4565_v47 = vadd.f32 %v1714_v51, %v1632_v41  ;;  %2215 = vmatmul.f32.gmra.mxu3 %v4550_v13  ;;  %5073 = vst [vmem:[#allocation50_spill] sm:$0xff] %v4575_v17  ;;  %v1906_v41 = vsub.f32 %v4554_v7, %v4571_v43  ;;  %v3467_v51 = vld [vmem:[%s3746_s30 + $0x70] sm:$0xff] }
 0x283   : > { %v1429_v34 = vpop.f32.mrf.mxu0  ;;  %v1546_v18 = vpop.f32.mrf.mxu1  ;;  %v1784_v58 = vsel %vm440_vm0, %v3467_v51, 0 }
 0x284   : > { %5071 = vst [vmem:[#allocation48_spill] sm:$0xff] %v4565_v47  ;;  %v1430_v26 = vadd.f32 %v1429_v34, %v4257_v57  ;;  %v1635_v31 = vpop.f32.mrf.mxu2  ;;  %v4584_v57 = vand.u32 4294901760, %v1784_v58 }
 0x285   : > { %v1718_v24 = vpop.f32.mrf.mxu3 }
 0x286   : > { %v1541_v42 = vadd.f32 %v1540_v22, %v1430_v26  ;;  %1900 = vmatmul.f32.gmra.mxu0 %v4568_v38  ;;  %2011 = vmatmul.f32.gmra.mxu1 %v4542_v39  ;;  %v4589_v26 = vand.u32 4294901760, %v1906_v41  ;;  %v4592_v22 = vand.u32 4294901760, %v4575_v17 }
 0x288   : > { %v1636_v47 = vadd.f32 %v1635_v31, %v1541_v42  ;;  %2109 = vmatmul.f32.gmra.mxu2 %v4554_v7  ;;  %5075 = vst [vmem:[#allocation52_spill] sm:$0xff] %v4592_v22  ;;  %v4596_v31 = vsub.f32 %v1784_v58, %v4584_v57 }
 0x28a   : > { %v4586_v34 = vadd.f32 %v1718_v24, %v1636_v47  ;;  %2221 = vmatmul.f32.gmra.mxu3 %v4571_v43  ;;  %v1914_v47 = vsub.f32 %v4575_v17, %v4592_v22  ;;  %v3468_v24 = vld [vmem:[%s3746_s30 + $0x78] sm:$0xff] }
 0x28b   : > { %v1434_v59 = vpop.f32.mrf.mxu0  ;;  %v1552_v13 = vpop.f32.mrf.mxu1  ;;  %v1787_v41 = vsel %vm440_vm0, %v3468_v24, 0 }
 0x28c   : > { %5074 = vst [vmem:[#allocation51_spill] sm:$0xff] %v4586_v34  ;;  %v1435_v60 = vadd.f32 %v1434_v59, %v4266_v16  ;;  %v1639_v51 = vpop.f32.mrf.mxu2  ;;  %v4605_v16 = vand.u32 4294901760, %v1787_v41 }
 0x28d   : > { %v1722_v42 = vpop.f32.mrf.mxu3 }
 0x28e   : > { %v1547_v7 = vadd.f32 %v1546_v18, %v1435_v60  ;;  %1908 = vmatmul.f32.gmra.mxu0 %v4589_v26  ;;  %2015 = vmatmul.f32.gmra.mxu1 %v4563_v49  ;;  %v4610_v60 = vand.u32 4294901760, %v1914_v47  ;;  %v4613_v18 = vand.u32 4294901760, %v4596_v31 }
 0x290   : > { %v1640_v34 = vadd.f32 %v1639_v51, %v1547_v7  ;;  %2114 = vmatmul.f32.gmra.mxu2 %v4575_v17  ;;  %v4617_v7 = vsub.f32 %v1787_v41, %v4605_v16 }
 0x292   : > { %v4607_v59 = vadd.f32 %v1722_v42, %v1640_v34  ;;  %2227 = vmatmul.f32.gmra.mxu3 %v4592_v22  ;;  %5077 = vst [vmem:[#allocation54_spill] sm:$0xff] %v4617_v7  ;;  %v1922_v34 = vsub.f32 %v4596_v31, %v4613_v18  ;;  %v4630_v41 = vand.u32 4294901760, %v4617_v7 }
 0x293   : > { %v1439_v58 = vpop.f32.mrf.mxu0  ;;  %v1558_v43 = vpop.f32.mrf.mxu1 }
 0x294   : > { %5076 = vst [vmem:[#allocation53_spill] sm:$0xff] %v4607_v59  ;;  %v1440_v30 = vadd.f32 %v1439_v58, %v4284_v46  ;;  %v1643_v28 = vpop.f32.mrf.mxu2  ;;  %v4627_v46 = vand.u32 4294901760, %v1922_v34 }
 0x295   : > { %v1726_v24 = vpop.f32.mrf.mxu3 }
 0x296   : > { %v1553_v51 = vadd.f32 %v1552_v13, %v1440_v30  ;;  %1916 = vmatmul.f32.gmra.mxu0 %v4610_v60  ;;  %2019 = vmatmul.f32.gmra.mxu1 %v4584_v57 }
 0x298   : > { %v1644_v42 = vadd.f32 %v1643_v28, %v1553_v51  ;;  %2119 = vmatmul.f32.gmra.mxu2 %v4596_v31  ;;  %v1930_v28 = vsub.f32 %v4617_v7, %v4630_v41 }
 0x29a   : > { %v4624_v47 = vadd.f32 %v1726_v24, %v1644_v42  ;;  %2233 = vmatmul.f32.gmra.mxu3 %v4613_v18  ;;  %v4641_v34 = vand.u32 4294901760, %v1930_v28 }
 0x29b   : > { %v1444_v30 = vpop.f32.mrf.mxu0  ;;  %v1564_v13 = vpop.f32.mrf.mxu1 }
 0x29c   : > { %5078 = vst [vmem:[#allocation55_spill] sm:$0xff] %v4624_v47  ;;  %v1445_v58 = vadd.f32 %v1444_v30, %v4301_v23  ;;  %v1647_v59 = vpop.f32.mrf.mxu2 }
 0x29d   : > { %v1730_v17 = vpop.f32.mrf.mxu3 }
 0x29e   : > { %v1559_v22 = vadd.f32 %v1558_v43, %v1445_v58  ;;  %1924 = vmatmul.f32.gmra.mxu0 %v4627_v46  ;;  %2023 = vmatmul.f32.gmra.mxu1 %v4605_v16 }
 0x2a0   : > { %v1648_v24 = vadd.f32 %v1647_v59, %v1559_v22  ;;  %2124 = vmatmul.f32.gmra.mxu2 %v4617_v7 }
 0x2a2   : > { %v4638_v51 = vadd.f32 %v1730_v17, %v1648_v24  ;;  %2239 = vmatmul.f32.gmra.mxu3 %v4630_v41 }
 0x2a3   : > { %v1449_v23 = vpop.f32.mrf.mxu0  ;;  %v1964_v42 = vpop.f32.mrf.mxu1 }
 0x2a4   : > { %5079 = vst [vmem:[#allocation56_spill] sm:$0xff] %v4638_v51  ;;  %v1450_v43 = vadd.f32 %v1449_v23, %v4322_v52  ;;  %v1651_v30 = vpop.f32.mrf.mxu2 }
 0x2a5   : > { %v1734_v58 = vpop.f32.mrf.mxu3 }
 0x2a6   : > { %v1565_v47 = vadd.f32 %v1564_v13, %v1450_v43  ;;  %1932 = vmatmul.f32.gmra.mxu0 %v4641_v34  ;;  %2349 = vmatmul.f32.vlgmr.msra.gmra.mxu1 %v4292_v44 }
 0x2a8   : > { %v1652_v22 = vadd.f32 %v1651_v30, %v1565_v47  ;;  %2436 = vmatmul.f32.vlgmr.msra.gmra.mxu2 %v4333_v12 }
 0x2aa   : > { %v4647_v17 = vadd.f32 %v1734_v58, %v1652_v22  ;;  %2587 = vmatmul.f32.vlgmr.msra.gmra.mxu3 %v4292_v44 }
 0x2ab   : > { %v1813_v59 = vpop.f32.mrf.mxu0  ;;  %v1968_v28 = vpop.f32.mrf.mxu1 }
 0x2ac   : > { %v1965_v24 = vadd.f32 %v1964_v42, %v1813_v59  ;;  %v2050_v51 = vpop.f32.mrf.mxu2 }
 0x2ad   : > { %v2150_v7 = vpop.f32.mrf.mxu3 }
 0x2ae   : > { %v2051_v52 = vadd.f32 %v2050_v51, %v1965_v24  ;;  %2266 = vmatmul.f32.vlgmr.msra.gmra.mxu0 %v4292_v44  ;;  %2353 = vmatmul.f32.gmra.mxu1 %v4311_v1 }
 0x2b0   : > { %v4652_v13 = vadd.f32 %v2150_v7, %v2051_v52  ;;  %2444 = vmatmul.f32.gmra.mxu2 %v4355_v3 }
 0x2b2   : > { %2591 = vmatmul.f32.gmra.mxu3 %v4311_v1 }
 0x2b3   : > { %v1821_v12 = vpop.f32.mrf.mxu0  ;;  %v1972_v47 = vpop.f32.mrf.mxu1 }
 0x2b4   : > { %v1969_v23 = vadd.f32 %v1968_v28, %v1821_v12  ;;  %v2055_v43 = vpop.f32.mrf.mxu2 }
 0x2b5   : > { %v2156_v30 = vpop.f32.mrf.mxu3 }
 0x2b6   : > { %v2056_v58 = vadd.f32 %v2055_v43, %v1969_v23  ;;  %2270 = vmatmul.f32.gmra.mxu0 %v4311_v1  ;;  %2357 = vmatmul.f32.gmra.mxu1 %v4330_v32 }
 0x2b8   : > { %v4658_v51 = vadd.f32 %v2156_v30, %v2056_v58  ;;  %2452 = vmatmul.f32.gmra.mxu2 %v4376_v61 }
 0x2ba   : > { %2595 = vmatmul.f32.gmra.mxu3 %v4330_v32 }
 0x2bb   : > { %v1829_v7 = vpop.f32.mrf.mxu0  ;;  %v1976_v3 = vpop.f32.mrf.mxu1 }
 0x2bc   : > { %v1973_v42 = vadd.f32 %v1972_v47, %v1829_v7  ;;  %v2060_v22 = vpop.f32.mrf.mxu2 }
 0x2bd   : > { %v2162_v59 = vpop.f32.mrf.mxu3 }
 0x2be   : > { %v2061_v24 = vadd.f32 %v2060_v22, %v1973_v42  ;;  %2274 = vmatmul.f32.gmra.mxu0 %v4330_v32  ;;  %2361 = vmatmul.f32.gmra.mxu1 %v4350_v54 }
 0x2c0   : > { %v4664_v28 = vadd.f32 %v2162_v59, %v2061_v24  ;;  %2460 = vmatmul.f32.gmra.mxu2 %v4397_v20 }
 0x2c2   : > { %2599 = vmatmul.f32.gmra.mxu3 %v4350_v54 }
 0x2c3   : > { %v1837_v52 = vpop.f32.mrf.mxu0  ;;  %v1980_v61 = vpop.f32.mrf.mxu1 }
 0x2c4   : > { %v1977_v12 = vadd.f32 %v1976_v3, %v1837_v52  ;;  %v2065_v23 = vpop.f32.mrf.mxu2 }
 0x2c5   : > { %v2168_v43 = vpop.f32.mrf.mxu3 }
 0x2c6   : > { %v2066_v30 = vadd.f32 %v2065_v23, %v1977_v12  ;;  %2278 = vmatmul.f32.gmra.mxu0 %v4350_v54  ;;  %2365 = vmatmul.f32.gmra.mxu1 %v4371_v35 }
 0x2c8   : > { %v4670_v47 = vadd.f32 %v2168_v43, %v2066_v30  ;;  %2468 = vmatmul.f32.gmra.mxu2 %v4418_v2 }
 0x2ca   : > { %2603 = vmatmul.f32.gmra.mxu3 %v4371_v35 }
 0x2cb   : > { %v1845_v58 = vpop.f32.mrf.mxu0  ;;  %v1984_v20 = vpop.f32.mrf.mxu1 }
 0x2cc   : > { %v1981_v7 = vadd.f32 %v1980_v61, %v1845_v58  ;;  %v2070_v42 = vpop.f32.mrf.mxu2 }
 0x2cd   : > { %v2174_v22 = vpop.f32.mrf.mxu3 }
 0x2ce   : > { %v2071_v59 = vadd.f32 %v2070_v42, %v1981_v7  ;;  %2282 = vmatmul.f32.gmra.mxu0 %v4371_v35  ;;  %2369 = vmatmul.f32.gmra.mxu1 %v4392_v53 }
 0x2d0   : > { %v4676_v3 = vadd.f32 %v2174_v22, %v2071_v59  ;;  %2476 = vmatmul.f32.gmra.mxu2 %v4439_v14 }
 0x2d2   : > { %2607 = vmatmul.f32.gmra.mxu3 %v4392_v53 }
 0x2d3   : > { %v1853_v24 = vpop.f32.mrf.mxu0  ;;  %v1988_v2 = vpop.f32.mrf.mxu1 }
 0x2d4   : > { %v1985_v52 = vadd.f32 %v1984_v20, %v1853_v24  ;;  %v2075_v12 = vpop.f32.mrf.mxu2 }
 0x2d5   : > { %v2180_v23 = vpop.f32.mrf.mxu3 }
 0x2d6   : > { %v2076_v43 = vadd.f32 %v2075_v12, %v1985_v52  ;;  %2286 = vmatmul.f32.gmra.mxu0 %v4392_v53  ;;  %2373 = vmatmul.f32.gmra.mxu1 %v4413_v40 }
 0x2d8   : > { %v4682_v61 = vadd.f32 %v2180_v23, %v2076_v43  ;;  %2484 = vmatmul.f32.gmra.mxu2 %v4462_v29 }
 0x2da   : > { %2611 = vmatmul.f32.gmra.mxu3 %v4413_v40 }
 0x2db   : > { %v1861_v30 = vpop.f32.mrf.mxu0  ;;  %v1992_v14 = vpop.f32.mrf.mxu1 }
 0x2dc   : > { %v1989_v58 = vadd.f32 %v1988_v2, %v1861_v30  ;;  %v2080_v7 = vpop.f32.mrf.mxu2 }
 0x2dd   : > { %v2186_v42 = vpop.f32.mrf.mxu3 }
 0x2de   : > { %v2081_v22 = vadd.f32 %v2080_v7, %v1989_v58  ;;  %2290 = vmatmul.f32.gmra.mxu0 %v4413_v40  ;;  %2377 = vmatmul.f32.gmra.mxu1 %v4434_v21 }
 0x2e0   : > { %v4688_v20 = vadd.f32 %v2186_v42, %v2081_v22  ;;  %2492 = vmatmul.f32.gmra.mxu2 %v4484_v56 }
 0x2e2   : > { %2615 = vmatmul.f32.gmra.mxu3 %v4434_v21 }
 0x2e3   : > { %v1869_v59 = vpop.f32.mrf.mxu0  ;;  %v1996_v29 = vpop.f32.mrf.mxu1 }
 0x2e4   : > { %v1993_v24 = vadd.f32 %v1992_v14, %v1869_v59  ;;  %v2085_v52 = vpop.f32.mrf.mxu2 }
 0x2e5   : > { %v2192_v12 = vpop.f32.mrf.mxu3 }
 0x2e6   : > { %v2086_v23 = vadd.f32 %v2085_v52, %v1993_v24  ;;  %2294 = vmatmul.f32.gmra.mxu0 %v4434_v21  ;;  %2381 = vmatmul.f32.gmra.mxu1 %v4457_v50 }
 0x2e8   : > { %v4694_v2 = vadd.f32 %v2192_v12, %v2086_v23  ;;  %2500 = vmatmul.f32.gmra.mxu2 %v4505_v25 }
 0x2ea   : > { %2619 = vmatmul.f32.gmra.mxu3 %v4457_v50 }
 0x2eb   : > { %v1877_v43 = vpop.f32.mrf.mxu0  ;;  %v2000_v56 = vpop.f32.mrf.mxu1 }
 0x2ec   : > { %v1997_v30 = vadd.f32 %v1996_v29, %v1877_v43  ;;  %v2090_v58 = vpop.f32.mrf.mxu2 }
 0x2ed   : > { %v2198_v7 = vpop.f32.mrf.mxu3 }
 0x2ee   : > { %v2091_v42 = vadd.f32 %v2090_v58, %v1997_v30  ;;  %2298 = vmatmul.f32.gmra.mxu0 %v4457_v50  ;;  %2385 = vmatmul.f32.gmra.mxu1 %v4479_v6 }
 0x2f0   : > { %v4700_v14 = vadd.f32 %v2198_v7, %v2091_v42  ;;  %2508 = vmatmul.f32.gmra.mxu2 %v4526_v4 }
 0x2f2   : > { %2623 = vmatmul.f32.gmra.mxu3 %v4479_v6 }
 0x2f3   : > { %v1885_v22 = vpop.f32.mrf.mxu0  ;;  %v2004_v25 = vpop.f32.mrf.mxu1 }
 0x2f4   : > { %v2001_v59 = vadd.f32 %v2000_v56, %v1885_v22  ;;  %v2095_v24 = vpop.f32.mrf.mxu2 }
 0x2f5   : > { %v2204_v52 = vpop.f32.mrf.mxu3 }
 0x2f6   : > { %v2096_v12 = vadd.f32 %v2095_v24, %v2001_v59  ;;  %2302 = vmatmul.f32.gmra.mxu0 %v4479_v6  ;;  %2389 = vmatmul.f32.gmra.mxu1 %v4500_v8 }
 0x2f8   : > { %v4706_v29 = vadd.f32 %v2204_v52, %v2096_v12  ;;  %2516 = vmatmul.f32.gmra.mxu2 %v4547_v55 }
 0x2fa   : > { %2627 = vmatmul.f32.gmra.mxu3 %v4500_v8 }
 0x2fb   : > { %v1893_v23 = vpop.f32.mrf.mxu0  ;;  %v2008_v4 = vpop.f32.mrf.mxu1 }
 0x2fc   : > { %v2005_v43 = vadd.f32 %v2004_v25, %v1893_v23  ;;  %v2100_v30 = vpop.f32.mrf.mxu2 }
 0x2fd   : > { %v2210_v58 = vpop.f32.mrf.mxu3 }
 0x2fe   : > { %v2101_v7 = vadd.f32 %v2100_v30, %v2005_v43  ;;  %2306 = vmatmul.f32.gmra.mxu0 %v4500_v8  ;;  %2393 = vmatmul.f32.gmra.mxu1 %v4521_v48 }
 0x300   : > { %v4712_v56 = vadd.f32 %v2210_v58, %v2101_v7  ;;  %2524 = vmatmul.f32.gmra.mxu2 %v4568_v38 }
 0x302   : > { %2631 = vmatmul.f32.gmra.mxu3 %v4521_v48 }
 0x303   : > { %v1901_v42 = vpop.f32.mrf.mxu0  ;;  %v2012_v55 = vpop.f32.mrf.mxu1 }
 0x304   : > { %v2009_v22 = vadd.f32 %v2008_v4, %v1901_v42  ;;  %v2105_v59 = vpop.f32.mrf.mxu2 }
 0x305   : > { %v2216_v24 = vpop.f32.mrf.mxu3 }
 0x306   : > { %v2106_v52 = vadd.f32 %v2105_v59, %v2009_v22  ;;  %2310 = vmatmul.f32.gmra.mxu0 %v4521_v48  ;;  %2397 = vmatmul.f32.gmra.mxu1 %v4542_v39 }
 0x308   : > { %v4718_v25 = vadd.f32 %v2216_v24, %v2106_v52  ;;  %2532 = vmatmul.f32.gmra.mxu2 %v4589_v26 }
 0x30a   : > { %2635 = vmatmul.f32.gmra.mxu3 %v4542_v39 }
 0x30b   : > { %v1909_v12 = vpop.f32.mrf.mxu0  ;;  %v2016_v38 = vpop.f32.mrf.mxu1 }
 0x30c   : > { %v2013_v23 = vadd.f32 %v2012_v55, %v1909_v12  ;;  %v2110_v43 = vpop.f32.mrf.mxu2 }
 0x30d   : > { %v2222_v30 = vpop.f32.mrf.mxu3 }
 0x30e   : > { %v2111_v58 = vadd.f32 %v2110_v43, %v2013_v23  ;;  %2314 = vmatmul.f32.gmra.mxu0 %v4542_v39  ;;  %2401 = vmatmul.f32.gmra.mxu1 %v4563_v49 }
 0x310   : > { %v4724_v4 = vadd.f32 %v2222_v30, %v2111_v58  ;;  %2540 = vmatmul.f32.gmra.mxu2 %v4610_v60 }
 0x312   : > { %2639 = vmatmul.f32.gmra.mxu3 %v4563_v49 }
 0x313   : > { %v1917_v7 = vpop.f32.mrf.mxu0  ;;  %v2020_v26 = vpop.f32.mrf.mxu1 }
 0x314   : > { %v2017_v42 = vadd.f32 %v2016_v38, %v1917_v7  ;;  %v2115_v22 = vpop.f32.mrf.mxu2 }
 0x315   : > { %v2228_v59 = vpop.f32.mrf.mxu3 }
 0x316   : > { %v2116_v24 = vadd.f32 %v2115_v22, %v2017_v42  ;;  %2318 = vmatmul.f32.gmra.mxu0 %v4563_v49  ;;  %2405 = vmatmul.f32.gmra.mxu1 %v4584_v57 }
 0x318   : > { %v4730_v55 = vadd.f32 %v2228_v59, %v2116_v24  ;;  %2548 = vmatmul.f32.gmra.mxu2 %v4627_v46 }
 0x31a   : > { %2643 = vmatmul.f32.gmra.mxu3 %v4584_v57 }
 0x31b   : > { %v1925_v52 = vpop.f32.mrf.mxu0  ;;  %v2024_v60 = vpop.f32.mrf.mxu1 }
 0x31c   : > { %v2021_v12 = vadd.f32 %v2020_v26, %v1925_v52  ;;  %v2120_v23 = vpop.f32.mrf.mxu2 }
 0x31d   : > { %v2234_v43 = vpop.f32.mrf.mxu3 }
 0x31e   : > { %v2121_v30 = vadd.f32 %v2120_v23, %v2021_v12  ;;  %2322 = vmatmul.f32.gmra.mxu0 %v4584_v57  ;;  %2409 = vmatmul.f32.gmra.mxu1 %v4605_v16 }
 0x320   : > { %v4736_v38 = vadd.f32 %v2234_v43, %v2121_v30  ;;  %2556 = vmatmul.f32.gmra.mxu2 %v4641_v34 }
 0x322   : > { %2647 = vmatmul.f32.gmra.mxu3 %v4605_v16 }
 0x323   : > { %v1933_v58 = vpop.f32.mrf.mxu0  ;;  %v2350_v46 = vpop.f32.mrf.mxu1 }
 0x324   : > { %v2025_v7 = vadd.f32 %v2024_v60, %v1933_v58  ;;  %v2125_v42 = vpop.f32.mrf.mxu2 }
 0x325   : > { %v2240_v22 = vpop.f32.mrf.mxu3 }
 0x326   : > { %v2126_v59 = vadd.f32 %v2125_v42, %v2025_v7  ;;  %2326 = vmatmul.f32.gmra.mxu0 %v4605_v16  ;;  %2773 = vmatmul.f32.vlgmr.msrb.gmra.mxu1 %v4309_v9 }
 0x328   : > { %v4742_v26 = vadd.f32 %v2240_v22, %v2126_v59  ;;  %2890 = vmatmul.f32.vlgmr.msrb.gmra.mxu2 %v4292_v44 }
 0x32a   : > { %2973 = vmatmul.f32.vlgmr.msrb.gmra.mxu3 %v4292_v44 }
 0x32b   : > { %v2267_v24 = vpop.f32.mrf.mxu0  ;;  %v2354_v34 = vpop.f32.mrf.mxu1 }
 0x32c   : > { %v2268_v52 = vadd.f32 %v2267_v24, %v4652_v13  ;;  %v2437_v12 = vpop.f32.mrf.mxu2 }
 0x32d   : > { %v2588_v23 = vpop.f32.mrf.mxu3 }
 0x32e   : > { %v2351_v60 = vadd.f32 %v2350_v46, %v2268_v52  ;;  %2673 = vmatmul.f32.vlgmr.msrb.gmra.mxu0 %v4297_v62  ;;  %v4748_v43 = vadd.f32 %v2588_v23, %v2437_v12  ;;  %2779 = vmatmul.f32.gmra.mxu1 %v4336_v19 }
 0x330   : > { %v3037_v9 = vmul.f32 %v2351_v60, %v4153_v15  ;;  %2894 = vmatmul.f32.gmra.mxu2 %v4311_v1 }
 0x332   : > { %2977 = vmatmul.f32.gmra.mxu3 %v4311_v1 }
 0x333   : > { %v2271_v44 = vpop.f32.mrf.mxu0  ;;  %v2358_v30 = vpop.f32.mrf.mxu1 }
 0x334   : > { %v2272_v58 = vadd.f32 %v2271_v44, %v4658_v51  ;;  %v2445_v13 = vpop.f32.mrf.mxu2 }
 0x335   : > { %v2592_v7 = vpop.f32.mrf.mxu3 }
 0x336   : > { %v2355_v42 = vadd.f32 %v2354_v34, %v2272_v58  ;;  %2678 = vmatmul.f32.gmra.mxu0 %v4318_v63  ;;  %v4756_v62 = vadd.f32 %v2592_v7, %v2445_v13  ;;  %2785 = vmatmul.f32.gmra.mxu1 %v4358_v36 }
 0x338   : > { %v3039_v19 = vmul.f32 %v2355_v42, %v4162_v0  ;;  %2898 = vmatmul.f32.gmra.mxu2 %v4330_v32 }
 0x33a   : > { %v3069_v15 = vadd.f32 %v3039_v19, %v3037_v9  ;;  %2981 = vmatmul.f32.gmra.mxu3 %v4330_v32 }
 0x33b   : > { %v2275_v1 = vpop.f32.mrf.mxu0  ;;  %v2362_v46 = vpop.f32.mrf.mxu1 }
 0x33c   : > { %v2276_v51 = vadd.f32 %v2275_v1, %v4664_v28  ;;  %v2453_v22 = vpop.f32.mrf.mxu2  ;;  %v3070_v36 = vrot.slane %v3069_v15, 4 }
 0x33d   : > { %v2596_v59 = vpop.f32.mrf.mxu3 }
 0x33e   : > { %v2359_v24 = vadd.f32 %v2358_v30, %v2276_v51  ;;  %2683 = vmatmul.f32.gmra.mxu0 %v4340_v27  ;;  %v4764_v63 = vadd.f32 %v2596_v59, %v2453_v22  ;;  %2791 = vmatmul.f32.gmra.mxu1 %v4379_v37  ;;  %v3071_v12 = vadd.f32 %v3070_v36, %v3069_v15  ;;  %v5081_v15 = vld [vmem:[#allocation27_spill] sm:$0xff] }
 0x340   : > { %v3041_v0 = vmul.f32 %v2359_v24, %v4171_v5  ;;  %2902 = vmatmul.f32.gmra.mxu2 %v4350_v54  ;;  %v3072_v37 = vrot.slane %v3071_v12, 2 }
 0x342   : > { %2985 = vmatmul.f32.gmra.mxu3 %v4350_v54  ;;  %v3073_v13 = vadd.f32 %v3072_v37, %v3071_v12 }
 0x343   : > { %v2279_v32 = vpop.f32.mrf.mxu0  ;;  %v2366_v34 = vpop.f32.mrf.mxu1 }
 0x344   : > { %v2280_v28 = vadd.f32 %v2279_v32, %v4670_v47  ;;  %v2461_v52 = vpop.f32.mrf.mxu2 }
 0x345   : > { %v2600_v23 = vpop.f32.mrf.mxu3 }
 0x346   : > { %v2363_v60 = vadd.f32 %v2362_v46, %v2280_v28  ;;  %2688 = vmatmul.f32.gmra.mxu0 %v4362_v33  ;;  %v4772_v27 = vadd.f32 %v2600_v23, %v2461_v52  ;;  %2797 = vmatmul.f32.gmra.mxu1 %v4400_v10  ;;  %v5083_v52 = vld [vmem:[#allocation24_spill] sm:$0xff] }
 0x348   : > { %v3043_v5 = vmul.f32 %v2363_v60, %v4180_v11  ;;  %2906 = vmatmul.f32.gmra.mxu2 %v4371_v35  ;;  %v5080_v11 = vld [vmem:[#allocation19_spill] sm:$0xff] }
 0x34a   : > { %v3083_v54 = vadd.f32 %v3043_v5, %v3041_v0  ;;  %2989 = vmatmul.f32.gmra.mxu3 %v4371_v35  ;;  %v3074_v35 = vrot.slane %v3073_v13, 1 }
 0x34b   : > { %v2283_v9 = vpop.f32.mrf.mxu0  ;;  %v2370_v47 = vpop.f32.mrf.mxu1 }
 0x34c   : > { %v3084_v44 = vrot.slane %v3083_v54, 4  ;;  %v2284_v30 = vadd.f32 %v2283_v9, %v4676_v3  ;;  %v2469_v58 = vpop.f32.mrf.mxu2 }
 0x34d   : > { %v2604_v33 = vpop.f32.mrf.mxu3 }
 0x34e   : > { %v3085_v7 = vadd.f32 %v3084_v44, %v3083_v54  ;;  %v2367_v42 = vadd.f32 %v2366_v34, %v2284_v30  ;;  %2693 = vmatmul.f32.gmra.mxu0 %v4383_v45  ;;  %v4780_v10 = vadd.f32 %v2604_v33, %v2469_v58  ;;  %2803 = vmatmul.f32.gmra.mxu1 %v5080_v11  ;;  %v5082_v34 = vld [vmem:[#allocation17_spill] sm:$0xff]  ;;  %v5085_v58 = vld [vmem:[#allocation22_spill] sm:$0xff] }
 0x34f   : > { %v3075_v45 = vadd.f32 %v3074_v35, %v3073_v13  ;;  %v5086_v33 = vld [vmem:[#allocation34_spill] sm:$0xff] }
 0x350   : > { %v3086_v19 = vrot.slane %v3085_v7, 2  ;;  %v3045_v1 = vmul.f32 %v2367_v42, %v5081_v15  ;;  %2910 = vmatmul.f32.gmra.mxu2 %v4392_v53  ;;  %v5087_v42 = vld [vmem:[#allocation29_spill] sm:$0xff] }
 0x352   : > { %v3087_v46 = vadd.f32 %v3086_v19, %v3085_v7  ;;  %2993 = vmatmul.f32.gmra.mxu3 %v4392_v53  ;;  %v5084_v53 = vld [vmem:[#allocation28_spill] sm:$0xff] }
 0x353   : > { %v2287_v3 = vpop.f32.mrf.mxu0  ;;  %v2374_v51 = vpop.f32.mrf.mxu1 }
 0x354   : > { %v3088_v22 = vrot.slane %v3087_v46, 1  ;;  %v2288_v59 = vadd.f32 %v2287_v3, %v4682_v61  ;;  %v2477_v24 = vpop.f32.mrf.mxu2 }
 0x355   : > { %v2608_v0 = vpop.f32.mrf.mxu3 }
 0x356   : > { %v3089_v36 = vadd.f32 %v3088_v22, %v3087_v46  ;;  %v2371_v32 = vadd.f32 %v2370_v47, %v2288_v59  ;;  %2698 = vmatmul.f32.gmra.mxu0 %v5082_v34  ;;  %v4788_v28 = vadd.f32 %v2608_v0, %v2477_v24  ;;  %2809 = vmatmul.f32.gmra.mxu1 %v5083_v52  ;;  %v5088_v22 = vld [vmem:[#allocation23_spill] sm:$0xff]  ;;  %v5089_v24 = vld [vmem:[#allocation37_spill] sm:$0xff]  ;;  %v5090_v0 = vld [vmem:[#allocation30_spill] sm:$0xff] }
 0x358   : > { %v3198_v12 = vsel %vm3197_vm1, %v3089_v36, %v3075_v45  ;;  %v3047_v23 = vmul.f32 %v2371_v32, %v5084_v53  ;;  %2914 = vmatmul.f32.gmra.mxu2 %v4413_v40 }
 0x35a   : > { %v3097_v60 = vadd.f32 %v3047_v23, %v3045_v1  ;;  %2997 = vmatmul.f32.gmra.mxu3 %v4413_v40 }
 0x35b   : > { %v2291_v61 = vpop.f32.mrf.mxu0  ;;  %v2378_v5 = vpop.f32.mrf.mxu1 }
 0x35c   : > { %v3098_v37 = vrot.slane %v3097_v60, 4  ;;  %v2292_v54 = vadd.f32 %v2291_v61, %v4688_v20  ;;  %v2485_v9 = vpop.f32.mrf.mxu2 }
 0x35d   : > { %v2612_v47 = vpop.f32.mrf.mxu3 }
 0x35e   : > { %v3099_v44 = vadd.f32 %v3098_v37, %v3097_v60  ;;  %v2375_v30 = vadd.f32 %v2374_v51, %v2292_v54  ;;  %2703 = vmatmul.f32.gmra.mxu0 %v5085_v58  ;;  %v4797_v13 = vadd.f32 %v2612_v47, %v2485_v9  ;;  %2815 = vmatmul.f32.gmra.mxu1 %v5086_v33  ;;  %v5093_v9 = vld [vmem:[#allocation31_spill] sm:$0xff] }
 0x360   : > { %v3100_v7 = vrot.slane %v3099_v44, 2  ;;  %v3049_v11 = vmul.f32 %v2375_v30, %v5087_v42  ;;  %2918 = vmatmul.f32.gmra.mxu2 %v4434_v21 }
 0x362   : > { %v3101_v40 = vadd.f32 %v3100_v7, %v3099_v44  ;;  %3001 = vmatmul.f32.gmra.mxu3 %v4434_v21 }
 0x363   : > { %v2295_v19 = vpop.f32.mrf.mxu0  ;;  %v2382_v20 = vpop.f32.mrf.mxu1 }
 0x364   : > { %v3102_v15 = vrot.slane %v3101_v40, 1  ;;  %v2296_v1 = vadd.f32 %v2295_v19, %v4694_v2  ;;  %v2493_v35 = vpop.f32.mrf.mxu2 }
 0x365   : > { %v2616_v46 = vpop.f32.mrf.mxu3 }
 0x366   : > { %v3103_v3 = vadd.f32 %v3102_v15, %v3101_v40  ;;  %v2379_v51 = vadd.f32 %v2378_v5, %v2296_v1  ;;  %2708 = vmatmul.f32.gmra.mxu0 %v5088_v22  ;;  %v4805_v59 = vadd.f32 %v2616_v46, %v2493_v35  ;;  %2821 = vmatmul.f32.gmra.mxu1 %v5089_v24  ;;  %v5091_v5 = vld [vmem:[#allocation35_spill] sm:$0xff]  ;;  %v5094_v40 = vld [vmem:[#allocation38_spill] sm:$0xff]  ;;  %v5096_v1 = vld [vmem:[#allocation32_spill] sm:$0xff] }
 0x368   : > { %v3200_v45 = vsel %vm3199_vm2, %v3103_v3, %v3198_v12  ;;  %v3051_v21 = vmul.f32 %v2379_v51, %v5090_v0  ;;  %2922 = vmatmul.f32.gmra.mxu2 %v4457_v50  ;;  %v5092_v12 = vld [vmem:[#allocation40_spill] sm:$0xff] }
 0x36a   : > { %v3111_v36 = vadd.f32 %v3051_v21, %v3049_v11  ;;  %3005 = vmatmul.f32.gmra.mxu3 %v4457_v50 }
 0x36b   : > { %v2299_v2 = vpop.f32.mrf.mxu0  ;;  %v2386_v32 = vpop.f32.mrf.mxu1 }
 0x36c   : > { %v3112_v34 = vrot.slane %v3111_v36, 4  ;;  %v2300_v52 = vadd.f32 %v2299_v2, %v4700_v14  ;;  %v2501_v53 = vpop.f32.mrf.mxu2 }
 0x36d   : > { %v2620_v23 = vpop.f32.mrf.mxu3 }
 0x36e   : > { %v3113_v60 = vadd.f32 %v3112_v34, %v3111_v36  ;;  %v2383_v61 = vadd.f32 %v2382_v20, %v2300_v52  ;;  %2713 = vmatmul.f32.gmra.mxu0 %v5091_v5  ;;  %v4814_v37 = vadd.f32 %v2620_v23, %v2501_v53  ;;  %2827 = vmatmul.f32.gmra.mxu1 %v5092_v12  ;;  %v5095_v20 = vld [vmem:[#allocation43_spill] sm:$0xff]  ;;  %v5097_v36 = vld [vmem:[#allocation41_spill] sm:$0xff] }
 0x36f   : > { %v5099_v34 = vld [vmem:[#allocation11_spill] sm:$0xff] }
 0x370   : > { %v3114_v54 = vrot.slane %v3113_v60, 2  ;;  %v3053_v47 = vmul.f32 %v2383_v61, %v5093_v9  ;;  %2926 = vmatmul.f32.gmra.mxu2 %v4479_v6  ;;  %v5100_v9 = vld [vmem:[#allocation44_spill] sm:$0xff] }
 0x372   : > { %v3115_v50 = vadd.f32 %v3114_v54, %v3113_v60  ;;  %3009 = vmatmul.f32.gmra.mxu3 %v4479_v6 }
 0x373   : > { %v2303_v44 = vpop.f32.mrf.mxu0  ;;  %v2390_v14 = vpop.f32.mrf.mxu1 }
 0x374   : > { %v3116_v30 = vrot.slane %v3115_v50, 1  ;;  %v2304_v58 = vadd.f32 %v2303_v44, %v4706_v29  ;;  %v2509_v33 = vpop.f32.mrf.mxu2 }
 0x375   : > { %v2624_v7 = vpop.f32.mrf.mxu3 }
 0x376   : > { %v3117_v42 = vadd.f32 %v3116_v30, %v3115_v50  ;;  %v2387_v11 = vadd.f32 %v2386_v32, %v2304_v58  ;;  %2718 = vmatmul.f32.gmra.mxu0 %v5094_v40  ;;  %v4822_v19 = vadd.f32 %v2624_v7, %v2509_v33  ;;  %2833 = vmatmul.f32.gmra.mxu1 %v5095_v20  ;;  %v5101_v50 = vld [vmem:[#allocation49_spill] sm:$0xff] }
 0x378   : > { %v3202_v15 = vsel %vm3201_vm3, %v3117_v42, %v3200_v45  ;;  %v3055_v6 = vmul.f32 %v2387_v11, %v5096_v1  ;;  %2930 = vmatmul.f32.gmra.mxu2 %v4500_v8  ;;  %v5098_v45 = vld [vmem:[#allocation46_spill] sm:$0xff]  ;;  %v5103_v1 = vld [vmem:[#allocation47_spill] sm:$0xff] }
 0x37a   : > { %v3125_v35 = vadd.f32 %v3055_v6, %v3053_v47  ;;  %3013 = vmatmul.f32.gmra.mxu3 %v4500_v8 }
 0x37b   : > { %v2307_v29 = vpop.f32.mrf.mxu0  ;;  %v2394_v46 = vpop.f32.mrf.mxu1 }
 0x37c   : > { %v3126_v3 = vrot.slane %v3125_v35, 4  ;;  %v2308_v51 = vadd.f32 %v2307_v29, %v4712_v56  ;;  %v2517_v22 = vpop.f32.mrf.mxu2  ;;  %v5105_v29 = vld [vmem:[#allocation12_spill] sm:$0xff] }
 0x37d   : > { %v2628_v24 = vpop.f32.mrf.mxu3 }
 0x37e   : > { %v3127_v0 = vadd.f32 %v3126_v3, %v3125_v35  ;;  %v2391_v21 = vadd.f32 %v2390_v14, %v2308_v51  ;;  %2723 = vmatmul.f32.gmra.mxu0 %v5097_v36  ;;  %v4831_v2 = vadd.f32 %v2628_v24, %v2517_v22  ;;  %2839 = vmatmul.f32.gmra.mxu1 %v5098_v45  ;;  %v5102_v14 = vld [vmem:[#allocation13_spill] sm:$0xff]  ;;  %v5106_v45 = vld [vmem:[#allocation50_spill] sm:$0xff] }
 0x380   : > { %v3128_v32 = vrot.slane %v3127_v0, 2  ;;  %v3057_v52 = vmul.f32 %v2391_v21, %v5099_v34  ;;  %2934 = vmatmul.f32.gmra.mxu2 %v4521_v48 }
 0x382   : > { %v3129_v8 = vadd.f32 %v3128_v32, %v3127_v0  ;;  %3017 = vmatmul.f32.gmra.mxu3 %v4521_v48 }
 0x383   : > { %v2311_v53 = vpop.f32.mrf.mxu0  ;;  %v2398_v56 = vpop.f32.mrf.mxu1 }
 0x384   : > { %v3130_v23 = vrot.slane %v3129_v8, 1  ;;  %v2312_v60 = vadd.f32 %v2311_v53, %v4718_v25  ;;  %v2525_v61 = vpop.f32.mrf.mxu2 }
 0x385   : > { %v2632_v5 = vpop.f32.mrf.mxu3 }
 0x386   : > { %v3131_v12 = vadd.f32 %v3130_v23, %v3129_v8  ;;  %v2395_v54 = vadd.f32 %v2394_v46, %v2312_v60  ;;  %2728 = vmatmul.f32.gmra.mxu0 %v5100_v9  ;;  %v4839_v47 = vadd.f32 %v2632_v5, %v2525_v61  ;;  %2845 = vmatmul.f32.gmra.mxu1 %v5101_v50  ;;  %v5108_v9 = vld [vmem:[#allocation25_spill] sm:$0xff] }
 0x388   : > { %v3204_v44 = vsel %vm3203_vm4, %v3131_v12, %v3202_v15  ;;  %v3059_v48 = vmul.f32 %v2395_v54, %v5102_v14  ;;  %2938 = vmatmul.f32.gmra.mxu2 %v4542_v39  ;;  %v5104_v15 = vld [vmem:[#allocation52_spill] sm:$0xff] }
 0x38a   : > { %v3139_v30 = vadd.f32 %v3059_v48, %v3057_v52  ;;  %3021 = vmatmul.f32.gmra.mxu3 %v4542_v39  ;;  %v5107_v52 = vld [vmem:[#allocation16_spill] sm:$0xff] }
 0x38b   : > { %v2315_v25 = vpop.f32.mrf.mxu0  ;;  %v2402_v58 = vpop.f32.mrf.mxu1 }
 0x38c   : > { %v3140_v33 = vrot.slane %v3139_v30, 4  ;;  %v2316_v7 = vadd.f32 %v2315_v25, %v4724_v4  ;;  %v2533_v42 = vpop.f32.mrf.mxu2 }
 0x38d   : > { %v2636_v11 = vpop.f32.mrf.mxu3 }
 0x38e   : > { %v3141_v40 = vadd.f32 %v3140_v33, %v3139_v30  ;;  %v2399_v20 = vadd.f32 %v2398_v56, %v2316_v7  ;;  %2733 = vmatmul.f32.gmra.mxu0 %v5103_v1  ;;  %v4848_v6 = vadd.f32 %v2636_v11, %v2533_v42  ;;  %2851 = vmatmul.f32.gmra.mxu1 %v5104_v15  ;;  %v5109_v33 = vld [vmem:[#allocation54_spill] sm:$0xff] }
 0x38f   : > { %v5110_v7 = vld [vmem:[#allocation14_spill] sm:$0xff] }
 0x390   : > { %v3142_v35 = vrot.slane %v3141_v40, 2  ;;  %v3061_v46 = vmul.f32 %v2399_v20, %v5105_v29  ;;  %2942 = vmatmul.f32.gmra.mxu2 %v4563_v49 }
 0x392   : > { %v3143_v39 = vadd.f32 %v3142_v35, %v3141_v40  ;;  %3025 = vmatmul.f32.gmra.mxu3 %v4563_v49 }
 0x393   : > { %v2319_v3 = vpop.f32.mrf.mxu0  ;;  %v2406_v4 = vpop.f32.mrf.mxu1 }
 0x394   : > { %v3144_v51 = vrot.slane %v3143_v39, 1  ;;  %v2320_v22 = vadd.f32 %v2319_v3, %v4730_v55  ;;  %v2541_v24 = vpop.f32.mrf.mxu2 }
 0x395   : > { %v2640_v0 = vpop.f32.mrf.mxu3 }
 0x396   : > { %v3145_v21 = vadd.f32 %v3144_v51, %v3143_v39  ;;  %v2403_v36 = vadd.f32 %v2402_v58, %v2320_v22  ;;  %2738 = vmatmul.f32.gmra.mxu0 %v5106_v45  ;;  %v4856_v32 = vadd.f32 %v2640_v0, %v2541_v24  ;;  %2857 = vmatmul.f32.gmra.mxu1 %v4613_v18 }
 0x398   : > { %v3206_v34 = vsel %vm3205_vm5, %v3145_v21, %v3204_v44  ;;  %v3063_v49 = vmul.f32 %v2403_v36, %v5107_v52  ;;  %2946 = vmatmul.f32.gmra.mxu2 %v4584_v57  ;;  %v5111_v21 = vld [vmem:[#allocation18_spill] sm:$0xff] }
 0x39a   : > { %v3153_v8 = vadd.f32 %v3063_v49, %v3061_v46  ;;  %3029 = vmatmul.f32.gmra.mxu3 %v4584_v57 }
 0x39b   : > { %v2323_v55 = vpop.f32.mrf.mxu0  ;;  %v2410_v53 = vpop.f32.mrf.mxu1 }
 0x39c   : > { %v3154_v56 = vrot.slane %v3153_v8, 4  ;;  %v2324_v23 = vadd.f32 %v2323_v55, %v4736_v38  ;;  %v2549_v60 = vpop.f32.mrf.mxu2 }
 0x39d   : > { %v2644_v61 = vpop.f32.mrf.mxu3 }
 0x39e   : > { %v3155_v5 = vadd.f32 %v3154_v56, %v3153_v8  ;;  %v2407_v12 = vadd.f32 %v2406_v4, %v2324_v23  ;;  %2743 = vmatmul.f32.gmra.mxu0 %v4596_v31  ;;  %v4865_v18 = vadd.f32 %v2644_v61, %v2549_v60  ;;  %2863 = vmatmul.f32.gmra.mxu1 %v4630_v41  ;;  %v5112_v60 = vld [vmem:[#allocation15_spill] sm:$0xff] }
 0x3a0   : > { %v3156_v54 = vrot.slane %v3155_v5, 2  ;;  %v3065_v50 = vmul.f32 %v2407_v12, %v5108_v9  ;;  %2950 = vmatmul.f32.gmra.mxu2 %v4605_v16 }
 0x3a2   : > { %v3157_v57 = vadd.f32 %v3156_v54, %v3155_v5  ;;  %3033 = vmatmul.f32.gmra.mxu3 %v4605_v16 }
 0x3a3   : > { %v2327_v44 = vpop.f32.mrf.mxu0  ;;  %v2774_v38 = vpop.f32.mrf.mxu1 }
 0x3a4   : > { %v3158_v14 = vrot.slane %v3157_v57, 1  ;;  %v2328_v48 = vadd.f32 %v2327_v44, %v4742_v26  ;;  %v2557_v30 = vpop.f32.mrf.mxu2 }
 0x3a5   : > { %v2648_v25 = vpop.f32.mrf.mxu3 }
 0x3a6   : > { %v3159_v31 = vadd.f32 %v3158_v14, %v3157_v57  ;;  %v2411_v58 = vadd.f32 %v2410_v53, %v2328_v48  ;;  %2748 = vmatmul.f32.gmra.mxu0 %v5109_v33  ;;  %v4873_v41 = vadd.f32 %v2648_v25, %v2557_v30  ;;  %v5113_v14 = vld [vmem:[#allocation26_spill] sm:$0xff] }
 0x3a8   : > { %v3067_v42 = vmul.f32 %v2411_v58, %v5110_v7  ;;  %v3208_v11 = vsel %vm3207_vm6, %v3159_v31, %v3206_v34 }
 0x3aa   : > { %v3167_v16 = vadd.f32 %v3067_v42, %v3065_v50 }
 0x3ab   : > { %v2674_v40 = vpop.f32.mrf.mxu0  ;;  %v2780_v20 = vpop.f32.mrf.mxu1 }
 0x3ac   : > { %v3168_v1 = vrot.slane %v3167_v16, 4  ;;  %v2675_v26 = vadd.f32 %v2674_v40, %v4748_v43  ;;  %v2891_v15 = vpop.f32.mrf.mxu2  ;;  %v5114_v40 = vld [vmem:[#allocation20_spill] sm:$0xff] }
 0x3ad   : > { %v2974_v35 = vpop.f32.mrf.mxu3 }
 0x3ae   : > { %v3169_v29 = vadd.f32 %v3168_v1, %v3167_v16  ;;  %v2775_v46 = vadd.f32 %v2774_v38, %v2675_v26 }
 0x3b0   : > { %v3170_v39 = vrot.slane %v3169_v29, 2  ;;  %v2892_v3 = vadd.f32 %v2891_v15, %v2775_v46 }
 0x3b2   : > { %v3171_v4 = vadd.f32 %v3170_v39, %v3169_v29  ;;  %v2975_v51 = vadd.f32 %v2974_v35, %v2892_v3 }
 0x3b3   : > { %v2679_v22 = vpop.f32.mrf.mxu0  ;;  %v2786_v24 = vpop.f32.mrf.mxu1 }
 0x3b4   : > { %v3172_v0 = vrot.slane %v3171_v4, 1  ;;  %v3038_v36 = vmul.f32 %v2975_v51, %v5111_v21  ;;  %v2680_v45 = vadd.f32 %v2679_v22, %v4756_v62  ;;  %v2895_v34 = vpop.f32.mrf.mxu2  ;;  %v5115_v21 = vld [vmem:[#allocation21_spill] sm:$0xff] }
 0x3b5   : > { %v2978_v43 = vpop.f32.mrf.mxu3 }
 0x3b6   : > { %v3173_v52 = vadd.f32 %v3172_v0, %v3171_v4  ;;  %v2781_v49 = vadd.f32 %v2780_v20, %v2680_v45 }
 0x3b8   : > { %v2896_v8 = vadd.f32 %v2895_v34, %v2781_v49  ;;  %v3210_v55 = vsel %vm3209_vm7, %v3173_v52, %v3208_v11 }
 0x3b9   : > { %3220 = vst [vmem:[%s4884_s7] sm:$0xff] %v3210_v55 }
 0x3ba   : > { %v2979_v53 = vadd.f32 %v2978_v43, %v2896_v8 }
 0x3bb   : > { %v2684_v56 = vpop.f32.mrf.mxu0  ;;  %v2792_v23 = vpop.f32.mrf.mxu1 }
 0x3bc   : > { %v3040_v61 = vmul.f32 %v2979_v53, %v5112_v60  ;;  %v2685_v5 = vadd.f32 %v2684_v56, %v4764_v63  ;;  %v2899_v62 = vpop.f32.mrf.mxu2 }
 0x3bd   : > { %v2982_v12 = vpop.f32.mrf.mxu3 }
 0x3be   : > { %v3076_v54 = vadd.f32 %v3040_v61, %v3038_v36  ;;  %v2787_v9 = vadd.f32 %v2786_v24, %v2685_v5 }
 0x3c0   : > { %v2900_v50 = vadd.f32 %v2899_v62, %v2787_v9  ;;  %v3077_v58 = vrot.slane %v3076_v54, 4  ;;  %v5116_v62 = vld [vmem:[#allocation33_spill] sm:$0xff] }
 0x3c2   : > { %v2983_v57 = vadd.f32 %v2982_v12, %v2900_v50  ;;  %v3078_v42 = vadd.f32 %v3077_v58, %v3076_v54  ;;  %v5117_v58 = vld [vmem:[#allocation36_spill] sm:$0xff] }
 0x3c3   : > { %v2689_v44 = vpop.f32.mrf.mxu0  ;;  %v2798_v38 = vpop.f32.mrf.mxu1 }
 0x3c4   : > { %v3042_v48 = vmul.f32 %v2983_v57, %v5113_v14  ;;  %v2690_v30 = vadd.f32 %v2689_v44, %v4772_v27  ;;  %v2903_v25 = vpop.f32.mrf.mxu2  ;;  %v3079_v35 = vrot.slane %v3078_v42, 2 }
 0x3c5   : > { %v2986_v31 = vpop.f32.mrf.mxu3 }
 0x3c6   : > { %v2793_v33 = vadd.f32 %v2792_v23, %v2690_v30  ;;  %v3080_v3 = vadd.f32 %v3079_v35, %v3078_v42 }
 0x3c8   : > { %v2904_v7 = vadd.f32 %v2903_v25, %v2793_v33 }
 0x3ca   : > { %v2987_v11 = vadd.f32 %v2986_v31, %v2904_v7 }
 0x3cb   : > { %v2694_v63 = vpop.f32.mrf.mxu0  ;;  %v2804_v16 = vpop.f32.mrf.mxu1 }
 0x3cc   : > { %v3044_v20 = vmul.f32 %v2987_v11, %v5114_v40  ;;  %v2695_v1 = vadd.f32 %v2694_v63, %v4780_v10  ;;  %v2907_v26 = vpop.f32.mrf.mxu2  ;;  %v3081_v10 = vrot.slane %v3080_v3, 1 }
 0x3cd   : > { %v2990_v15 = vpop.f32.mrf.mxu3 }
 0x3ce   : > { %v3090_v29 = vadd.f32 %v3044_v20, %v3042_v48  ;;  %v2799_v46 = vadd.f32 %v2798_v38, %v2695_v1  ;;  %v3082_v53 = vadd.f32 %v3081_v10, %v3080_v3 }
 0x3d0   : > { %v3091_v39 = vrot.slane %v3090_v29, 4  ;;  %v2908_v27 = vadd.f32 %v2907_v26, %v2799_v46 }
 0x3d2   : > { %v3092_v4 = vadd.f32 %v3091_v39, %v3090_v29  ;;  %v2991_v51 = vadd.f32 %v2990_v15, %v2908_v27  ;;  %v5118_v29 = vld [vmem:[#allocation39_spill] sm:$0xff] }
 0x3d3   : > { %v2699_v22 = vpop.f32.mrf.mxu0  ;;  %v2810_v24 = vpop.f32.mrf.mxu1 }
 0x3d4   : > { %v3093_v0 = vrot.slane %v3092_v4, 2  ;;  %v3046_v36 = vmul.f32 %v2991_v51, %v5115_v21  ;;  %v2700_v45 = vadd.f32 %v2699_v22, %v4788_v28  ;;  %v2911_v34 = vpop.f32.mrf.mxu2 }
 0x3d5   : > { %v2994_v43 = vpop.f32.mrf.mxu3 }
 0x3d6   : > { %v3094_v52 = vadd.f32 %v3093_v0, %v3092_v4  ;;  %v2805_v49 = vadd.f32 %v2804_v16, %v2700_v45 }
 0x3d8   : > { %v3095_v8 = vrot.slane %v3094_v52, 1  ;;  %v2912_v55 = vadd.f32 %v2911_v34, %v2805_v49  ;;  %v5119_v34 = vld [vmem:[#allocation42_spill] sm:$0xff] }
 0x3da   : > { %v3096_v56 = vadd.f32 %v3095_v8, %v3094_v52  ;;  %v2995_v23 = vadd.f32 %v2994_v43, %v2912_v55 }
 0x3db   : > { %v2704_v60 = vpop.f32.mrf.mxu0  ;;  %v2816_v61 = vpop.f32.mrf.mxu1 }
 0x3dc   : > { %v3211_v5 = vsel %vm3197_vm1, %v3096_v56, %v3082_v53  ;;  %v3048_v12 = vmul.f32 %v2995_v23, %v5116_v62  ;;  %v2705_v54 = vadd.f32 %v2704_v60, %v4797_v13  ;;  %v2915_v9 = vpop.f32.mrf.mxu2  ;;  %v5120_v62 = vld [vmem:[#allocation45_spill] sm:$0xff] }
 0x3dd   : > { %v2998_v28 = vpop.f32.mrf.mxu3 }
 0x3de   : > { %v3104_v50 = vadd.f32 %v3048_v12, %v3046_v36  ;;  %v2811_v57 = vadd.f32 %v2810_v24, %v2705_v54 }
 0x3e0   : > { %v3105_v44 = vrot.slane %v3104_v50, 4  ;;  %v2916_v38 = vadd.f32 %v2915_v9, %v2811_v57 }
 0x3e2   : > { %v3106_v14 = vadd.f32 %v3105_v44, %v3104_v50  ;;  %v2999_v48 = vadd.f32 %v2998_v28, %v2916_v38 }
 0x3e3   : > { %v2709_v30 = vpop.f32.mrf.mxu0  ;;  %v2822_v25 = vpop.f32.mrf.mxu1 }
 0x3e4   : > { %v3107_v31 = vrot.slane %v3106_v14, 2  ;;  %v3050_v33 = vmul.f32 %v2999_v48, %v5117_v58  ;;  %v2710_v7 = vadd.f32 %v2709_v30, %v4805_v59  ;;  %v2919_v42 = vpop.f32.mrf.mxu2 }
 0x3e5   : > { %v3002_v11 = vpop.f32.mrf.mxu3 }
 0x3e6   : > { %v3108_v63 = vadd.f32 %v3107_v31, %v3106_v14  ;;  %v2817_v16 = vadd.f32 %v2816_v61, %v2710_v7 }
 0x3e8   : > { %v3109_v13 = vrot.slane %v3108_v63, 1  ;;  %v2920_v40 = vadd.f32 %v2919_v42, %v2817_v16 }
 0x3ea   : > { %v3110_v20 = vadd.f32 %v3109_v13, %v3108_v63  ;;  %v3003_v1 = vadd.f32 %v3002_v11, %v2920_v40 }
 0x3eb   : > { %v2714_v26 = vpop.f32.mrf.mxu0  ;;  %v2828_v15 = vpop.f32.mrf.mxu1 }
 0x3ec   : > { %v3212_v35 = vsel %vm3199_vm2, %v3110_v20, %v3211_v5  ;;  %v3052_v46 = vmul.f32 %v3003_v1, %v5118_v29  ;;  %v2715_v39 = vadd.f32 %v2714_v26, %v4814_v37  ;;  %v2923_v27 = vpop.f32.mrf.mxu2  ;;  %v5122_v26 = vld [vmem:[#allocation51_spill] sm:$0xff] }
 0x3ed   : > { %v3006_v3 = vpop.f32.mrf.mxu3 }
 0x3ee   : > { %v3118_v4 = vadd.f32 %v3052_v46, %v3050_v33  ;;  %v2823_v59 = vadd.f32 %v2822_v25, %v2715_v39  ;;  %v5121_v25 = vld [vmem:[#allocation48_spill] sm:$0xff] }
 0x3f0   : > { %v3119_v51 = vrot.slane %v3118_v4, 4  ;;  %v2924_v22 = vadd.f32 %v2923_v27, %v2823_v59 }
 0x3f2   : > { %v3120_v24 = vadd.f32 %v3119_v51, %v3118_v4  ;;  %v3007_v0 = vadd.f32 %v3006_v3, %v2924_v22 }
 0x3f3   : > { %v2719_v21 = vpop.f32.mrf.mxu0  ;;  %v2834_v36 = vpop.f32.mrf.mxu1 }
 0x3f4   : > { %v3121_v45 = vrot.slane %v3120_v24, 2  ;;  %v3054_v43 = vmul.f32 %v3007_v0, %v5119_v34  ;;  %v2720_v10 = vadd.f32 %v2719_v21, %v4822_v19  ;;  %v2927_v52 = vpop.f32.mrf.mxu2  ;;  %v5123_v0 = vld [vmem:[#allocation53_spill] sm:$0xff] }
 0x3f5   : > { %v3010_v49 = vpop.f32.mrf.mxu3 }
 0x3f6   : > { %v3122_v8 = vadd.f32 %v3121_v45, %v3120_v24  ;;  %v2829_v55 = vadd.f32 %v2828_v15, %v2720_v10 }
 0x3f8   : > { %v3123_v37 = vrot.slane %v3122_v8, 1  ;;  %v2928_v53 = vadd.f32 %v2927_v52, %v2829_v55 }
 0x3fa   : > { %v3124_v56 = vadd.f32 %v3123_v37, %v3122_v8  ;;  %v3011_v23 = vadd.f32 %v3010_v49, %v2928_v53 }
 0x3fb   : > { %v2724_v60 = vpop.f32.mrf.mxu0  ;;  %v2840_v61 = vpop.f32.mrf.mxu1 }
 0x3fc   : > { %v3213_v5 = vsel %vm3201_vm3, %v3124_v56, %v3212_v35  ;;  %v3056_v12 = vmul.f32 %v3011_v23, %v5120_v62  ;;  %v2725_v54 = vadd.f32 %v2724_v60, %v4831_v2  ;;  %v2931_v9 = vpop.f32.mrf.mxu2  ;;  %v5124_v56 = vld [vmem:[#allocation55_spill] sm:$0xff] }
 0x3fd   : > { %v3014_v28 = vpop.f32.mrf.mxu3 }
 0x3fe   : > { %v3132_v50 = vadd.f32 %v3056_v12, %v3054_v43  ;;  %v2835_v19 = vadd.f32 %v2834_v36, %v2725_v54 }
 0x400   : > { %v3133_v57 = vrot.slane %v3132_v50, 4  ;;  %v2932_v44 = vadd.f32 %v2931_v9, %v2835_v19 }
 0x402   : > { %v3134_v38 = vadd.f32 %v3133_v57, %v3132_v50  ;;  %v3015_v14 = vadd.f32 %v3014_v28, %v2932_v44  ;;  %v5125_v44 = vld [vmem:[#allocation56_spill] sm:$0xff] }
 0x403   : > { %v2729_v48 = vpop.f32.mrf.mxu0  ;;  %v2846_v42 = vpop.f32.mrf.mxu1 }
 0x404   : > { %v3135_v30 = vrot.slane %v3134_v38, 2  ;;  %v3058_v31 = vmul.f32 %v3015_v14, %v5121_v25  ;;  %v2730_v58 = vadd.f32 %v2729_v48, %v4839_v47  ;;  %v2935_v33 = vpop.f32.mrf.mxu2 }
 0x405   : > { %v3018_v7 = vpop.f32.mrf.mxu3 }
 0x406   : > { %v3136_v11 = vadd.f32 %v3135_v30, %v3134_v38  ;;  %v2841_v63 = vadd.f32 %v2840_v61, %v2730_v58 }
 0x408   : > { %v3137_v2 = vrot.slane %v3136_v11, 1  ;;  %v2936_v16 = vadd.f32 %v2935_v33, %v2841_v63 }
 0x40a   : > { %v3138_v13 = vadd.f32 %v3137_v2, %v3136_v11  ;;  %v3019_v40 = vadd.f32 %v3018_v7, %v2936_v16 }
 0x40b   : > { %v2734_v20 = vpop.f32.mrf.mxu0  ;;  %v2852_v27 = vpop.f32.mrf.mxu1 }
 0x40c   : > { %v3214_v1 = vsel %vm3203_vm4, %v3138_v13, %v3213_v5  ;;  %v3060_v15 = vmul.f32 %v3019_v40, %v5122_v26  ;;  %v2735_v35 = vadd.f32 %v2734_v20, %v4848_v6  ;;  %v2939_v29 = vpop.f32.mrf.mxu2 }
 0x40d   : > { %v3022_v46 = vpop.f32.mrf.mxu3 }
 0x40e   : > { %v3146_v39 = vadd.f32 %v3060_v15, %v3058_v31  ;;  %v2847_v47 = vadd.f32 %v2846_v42, %v2735_v35 }
 0x410   : > { %v3147_v3 = vrot.slane %v3146_v39, 4  ;;  %v2940_v4 = vadd.f32 %v2939_v29, %v2847_v47 }
 0x412   : > { %v3148_v59 = vadd.f32 %v3147_v3, %v3146_v39  ;;  %v3023_v51 = vadd.f32 %v3022_v46, %v2940_v4 }
 0x413   : > { %v2739_v22 = vpop.f32.mrf.mxu0  ;;  %v2858_v49 = vpop.f32.mrf.mxu1 }
 0x414   : > { %v3149_v24 = vrot.slane %v3148_v59, 2  ;;  %v3062_v21 = vmul.f32 %v3023_v51, %v5123_v0  ;;  %v2740_v36 = vadd.f32 %v2739_v22, %v4856_v32  ;;  %v2943_v45 = vpop.f32.mrf.mxu2 }
 0x415   : > { %v3026_v34 = vpop.f32.mrf.mxu3 }
 0x416   : > { %v3150_v43 = vadd.f32 %v3149_v24, %v3148_v59  ;;  %v2853_v10 = vadd.f32 %v2852_v27, %v2740_v36 }
 0x418   : > { %v3151_v6 = vrot.slane %v3150_v43, 1  ;;  %v2944_v52 = vadd.f32 %v2943_v45, %v2853_v10 }
 0x41a   : > { %v3152_v8 = vadd.f32 %v3151_v6, %v3150_v43  ;;  %v3027_v55 = vadd.f32 %v3026_v34, %v2944_v52 }
 0x41b   : > { %v2744_v37 = vpop.f32.mrf.mxu0  ;;  %v2864_v19 = vpop.f32.mrf.mxu1 }
 0x41c   : > { %v3215_v53 = vsel %vm3205_vm5, %v3152_v8, %v3214_v1  ;;  %v3064_v23 = vmul.f32 %v3027_v55, %v5124_v56  ;;  %v2745_v60 = vadd.f32 %v2744_v37, %v4865_v18  ;;  %v2947_v61 = vpop.f32.mrf.mxu2 }
 0x41d   : > { %v3030_v5 = vpop.f32.mrf.mxu3 }
 0x41e   : > { %v3160_v62 = vadd.f32 %v3064_v23, %v3062_v21  ;;  %v2859_v32 = vadd.f32 %v2858_v49, %v2745_v60 }
 0x420   : > { %v3161_v12 = vrot.slane %v3160_v62, 4  ;;  %v2948_v54 = vadd.f32 %v2947_v61, %v2859_v32 }
 0x422   : > { %v3162_v9 = vadd.f32 %v3161_v12, %v3160_v62  ;;  %v3031_v28 = vadd.f32 %v3030_v5, %v2948_v54 }
 0x423   : > { %v2749_v50 = vpop.f32.mrf.mxu0 }
 0x424   : > { %v3163_v57 = vrot.slane %v3162_v9, 2  ;;  %v3066_v38 = vmul.f32 %v3031_v28, %v5125_v44  ;;  %v2750_v14 = vadd.f32 %v2749_v50, %v4873_v41  ;;  %v2951_v48 = vpop.f32.mrf.mxu2 }
 0x425   : > { %v3034_v18 = vpop.f32.mrf.mxu3 }
 0x426   : > { %v3164_v30 = vadd.f32 %v3163_v57, %v3162_v9  ;;  %v2865_v25 = vadd.f32 %v2864_v19, %v2750_v14 }
 0x428   : > { %v3165_v31 = vrot.slane %v3164_v30, 1  ;;  %v2952_v58 = vadd.f32 %v2951_v48, %v2865_v25 }
 0x42a   : > { %v3166_v33 = vadd.f32 %v3165_v31, %v3164_v30  ;;  %v3035_v7 = vadd.f32 %v3034_v18, %v2952_v58 }
 0x42c   : > { %v3068_v42 = vmul.f32 %v3035_v7, %v4647_v17  ;;  %v3216_v11 = vsel %vm3207_vm6, %v3166_v33, %v3215_v53 }
 0x42e   : > { %v3174_v63 = vadd.f32 %v3068_v42, %v3066_v38 }
 0x430   : > { %v3175_v2 = vrot.slane %v3174_v63, 4 }
 0x432   : > { %v3176_v16 = vadd.f32 %v3175_v2, %v3174_v63 }
 0x434   : > { %v3177_v41 = vrot.slane %v3176_v16, 2 }
 0x436   : > { %v3178_v13 = vadd.f32 %v3177_v41, %v3176_v16 }
 0x438   : > { %v3179_v40 = vrot.slane %v3178_v13, 1 }
 0x43a   : > { %v3180_v20 = vadd.f32 %v3179_v40, %v3178_v13 }
 0x43c   : > { %v3217_v17 = vsel %vm3209_vm7, %v3180_v20, %v3216_v11 }
 0x43d   : > { %3221 = vst [vmem:[%s4884_s7 + $0x8] sm:$0xff] %v3217_v17 }
 0x43e   : > { %3556 = shalt.err (!%p3553_p8)
}
 0x43f   : > { %3363 = dma.vmem_to_hbm [thread:$0]  (%p3669_p5), %s3237_s12, 256, %s3239_s13, %s3223_s14  }
 0x440 PF: > { %p3380_p9 = scmp.ge.s32.totalorder %s3599_s18, 2  ;;  %s3250_s30 = sand.u32 1, %s3587_s15  }
 0x441   : > { %s3251_s5 = scalar_lea.sflag [#allocation4], %s3250_s30 }
 0x442   : > { %p3373_p10 = pnand %p3380_p9, %p3673_p6 }
 0x444   : > { %p3374_p11 = pneg %p3373_p10 }
 0x446   : > { %3582 = dma.done.wait (%p3374_p11), %s3251_s5, 256  }
 0x447   : > { %3584 = vsyncadd (%p3374_p11), %s3251_s5, 4294967040  ;;  %p16_p12 = scmp.ge.s32.totalorder %s3656_s21, 4   ;;  %s5126_s15 = smov %s3591_s16 }
 0x448   : > { %s5127_s16 = smov %s3595_s17  ;;  %s5128_s17 = smov %s3667_s24 }
 0x449   : > { %s5129_s18 = smov %s3656_s21  ;;  %18 = sbr.rel (!%p16_p12) target bundleno = 5 (0x5), region = 83 }
 0x44e   :  { %3257 = vsyncpa [#allocation3], 1 }
 0x44f   :  { %3259 = vsyncpa [#allocation3 + $0x1], 1 }
 0x450   :  { %3260 = vsyncpa [#allocation6], 1 }
 0x451   :  { %3261 = vsyncpa [#allocation4], 1 }
 0x452   :  { %3263 = vsyncpa [#allocation4 + $0x1], 1 }

</bundles_post_ra>
